<compile_context>
chip_gen: v7x
topology: tpu7x:2x2x1
jax: 0.10.0
libtpu: 0.0.40
codegen_flags: <defaults>
</compile_context>

<pallas_src>
import functools

import jax
import jax.numpy as jnp
from jax.experimental import pallas as pl
from jax.experimental.pallas import tpu as pltpu

INPUT_SIZE = 3
OUTPUT_SIZE = 6
HIDDEN = (392, 392, 392, 392)   # module default hidden_layer_units

PAD_HIDDEN = 512                # 392 zero-padded to a lane/MXU-friendly width
PAD_OUT = 128                   # 6 zero-padded to a lane-dense output slab
DEFAULT_TILE_B = 2048           # batch rows per grid step (review: 1024-2048)
VMEM_LIMIT_BYTES = 48 * 1024 * 1024


def _mlp_kernel(x_ref,
                w1_ref, b1_ref,
                w2_ref, b2_ref,
                w3_ref, b3_ref,
                w4_ref, b4_ref,
                w5_ref, b5_ref,
                o_ref):
    # Layer 1 on the VPU, full f32 (K=3 is too small to feed the MXU well):
    #   (tb, 1) * (1, 512) broadcasts, summed over the 3 input features.
    x = x_ref[...]                       # (tb, 3) f32
    w1 = w1_ref[...]                     # (3, 512) f32
    h = (x[:, 0:1] * w1[0:1, :]
         + x[:, 1:2] * w1[1:2, :]
         + x[:, 2:3] * w1[2:3, :]
         + b1_ref[...])
    h = jnp.maximum(h, 0.0)

    # Hidden layers: (tb, 512) @ (512, 512), bf16 operands, f32 accumulate.
    h = jnp.dot(h.astype(jnp.bfloat16), w2_ref[...],
                preferred_element_type=jnp.float32)
    h = jnp.maximum(h + b2_ref[...], 0.0)

    h = jnp.dot(h.astype(jnp.bfloat16), w3_ref[...],
                preferred_element_type=jnp.float32)
    h = jnp.maximum(h + b3_ref[...], 0.0)

    h = jnp.dot(h.astype(jnp.bfloat16), w4_ref[...],
                preferred_element_type=jnp.float32)
    h = jnp.maximum(h + b4_ref[...], 0.0)

    # Final layer: (tb, 512) @ (512, 128), lane-dense store; no activation.
    out = jnp.dot(h.astype(jnp.bfloat16), w5_ref[...],
                  preferred_element_type=jnp.float32)
    o_ref[...] = out + b5_ref[...]


def _round_up(n, m):
    return int(pl.cdiv(n, m)) * m


def _pad_to(arr, shape):
    pads = [(0, t - s) for s, t in zip(arr.shape, shape)]
    return jnp.pad(arr, pads)


def _choose_tile(batch, tile_b):
    """Balanced batch tiling with >=2 grid steps whenever B > 8.

    Returns (tb, n_steps) with tb a multiple of 8 and n_steps * tb >= batch.
    """
    n_steps = max(int(pl.cdiv(batch, tile_b)), 1)
    if batch > 8:
        n_steps = max(n_steps, 2)   # let both v7x TensorCores get work
    tb = _round_up(int(pl.cdiv(batch, n_steps)), 8)
    return tb, n_steps


def prepare_params(params):
    """Zero-pad weights/biases to lane-friendly widths.

    params: list of (W (in, out) f32, b (1, out) f32) with original shapes
            [(3,392), (392,392) x3, (392,6)].
    Returns: [(W1 f32 (3,512),  b1 f32 (1,512)),
              (W  bf16 (512,512), b f32 (1,512)) x3,
              (W5 bf16 (512,128), b5 f32 (1,128))]
    Layer 1 stays f32 (it runs on the VPU); hidden/final weights are bf16.
    """
    in_dims = [INPUT_SIZE] + [PAD_HIDDEN] * len(HIDDEN)
    out_dims = [PAD_HIDDEN] * len(HIDDEN) + [PAD_OUT]
    prepared = []
    for idx, ((w, b), pin, pout) in enumerate(zip(params, in_dims, out_dims)):
        wp = _pad_to(w.astype(jnp.float32), (pin, pout))
        if idx > 0:
            wp = wp.astype(jnp.bfloat16)
        bp = _pad_to(b.astype(jnp.float32), (1, pout))
        prepared.append((wp, bp))
    return prepared


@functools.partial(jax.jit, static_argnames=("tile_b",))
def pose_interpolator_forward(x, prepared_params, *, tile_b=DEFAULT_TILE_B):
    """x: (B, 3) float32; prepared_params: output of prepare_params()."""
    B = x.shape[0]
    if B == 0:   # guard: empty batch would divide the grid by zero
        return jnp.zeros((0, OUTPUT_SIZE), jnp.float32)

    tb, n_steps = _choose_tile(B, tile_b)
    b_padded = tb * n_steps
    x_p = _pad_to(x.astype(jnp.float32), (b_padded, INPUT_SIZE))

    flat_args = [x_p]
    in_specs = [pl.BlockSpec((tb, INPUT_SIZE), lambda i: (i, 0))]
    for w, b in prepared_params:
        flat_args += [w, b]
        # Constant index_map -> weights/biases DMA'd once, VMEM-resident
        # across all batch-grid steps.
        in_specs += [pl.BlockSpec(w.shape, lambda i: (0, 0)),
                     pl.BlockSpec(b.shape, lambda i: (0, 0))]

    flops = 2 * b_padded * (INPUT_SIZE * PAD_HIDDEN
                            + (len(HIDDEN) - 1) * PAD_HIDDEN * PAD_HIDDEN
                            + PAD_HIDDEN * PAD_OUT)
    weight_bytes = sum(int(w.size) * w.dtype.itemsize
                       + int(b.size) * b.dtype.itemsize
                       for w, b in prepared_params)
    bytes_accessed = (int(x_p.size) * 4
                      + b_padded * PAD_OUT * 4
                      + weight_bytes)

    out_padded = pl.pallas_call(
        _mlp_kernel,
        grid=(n_steps,),
        out_shape=jax.ShapeDtypeStruct((b_padded, PAD_OUT), jnp.float32),
        in_specs=in_specs,
        out_specs=pl.BlockSpec((tb, PAD_OUT), lambda i: (i, 0)),
        compiler_params=pltpu.CompilerParams(
            dimension_semantics=("parallel",),
            vmem_limit_bytes=VMEM_LIMIT_BYTES),
        cost_estimate=pl.CostEstimate(
            flops=flops, transcendentals=0, bytes_accessed=bytes_accessed),
    )(*flat_args)

    return out_padded[:B, :OUTPUT_SIZE]


def init_params(key):
    """Deterministic synthetic weights matching nn.Linear shapes.

    PyTorch nn.Linear(in, out) stores weight (out, in); we store the transpose
    (in, out) so the kernel does x @ W directly.
    """
    # TODO(synk): real deployment loads weights from deployment_models/*.pth;
    # synthetic deterministic weights are used here instead.
    sizes = (INPUT_SIZE,) + HIDDEN + (OUTPUT_SIZE,)
    params = []
    for i in range(len(sizes) - 1):
        fan_in, fan_out = sizes[i], sizes[i + 1]
        key, kw, kb = jax.random.split(key, 3)
        bound = 1.0 / jnp.sqrt(jnp.float32(fan_in))
        w = jax.random.uniform(kw, (fan_in, fan_out), jnp.float32, -bound, bound)
        b = jax.random.uniform(kb, (1, fan_out), jnp.float32, -bound, bound)
        params.append((w, b))
    return params


def reference_forward_mixed(x, prepared_params):
    """Reference mimicking the kernel exactly: f32 layer 1, bf16 hidden dots."""
    w1, b1 = prepared_params[0]
    h = (x[:, 0:1] * w1[0:1, :] + x[:, 1:2] * w1[1:2, :]
         + x[:, 2:3] * w1[2:3, :] + b1)
    h = jnp.maximum(h, 0.0)
    n = len(prepared_params)
    for i in range(1, n):
        w, b = prepared_params[i]
        h = jnp.dot(h.astype(jnp.bfloat16), w,
                    preferred_element_type=jnp.float32) + b
        if i < n - 1:
            h = jnp.maximum(h, 0.0)
    return h[:, :OUTPUT_SIZE]


def reference_forward_f32(x, params):
    """Full-precision reference of the original module forward."""
    h = x
    for i, (w, b) in enumerate(params):
        h = h @ w + b
        if i < len(params) - 1:
            h = jnp.maximum(h, 0.0)
    return h


if __name__ == "__main__":
    key = jax.random.PRNGKey(0)
    key, kx = jax.random.split(key)

    batch = 16
    x = jax.random.normal(kx, (batch, INPUT_SIZE), dtype=jnp.float32)

    params = init_params(key)
    prepared = prepare_params(params)

    out = pose_interpolator_forward(x, prepared)
    out = jax.block_until_ready(out)
    assert out.shape == (batch, OUTPUT_SIZE)

    # Exact-structure check (same f32 layer-1 / bf16 hidden dots as the kernel).
    ref_mixed = reference_forward_mixed(x, prepared)
    assert jnp.allclose(out, ref_mixed, atol=1e-2, rtol=1e-2), (
        float(jnp.max(jnp.abs(out - ref_mixed))))

    # Loose semantic check against the original f32 module forward.
    ref_f32 = reference_forward_f32(x, params)
    assert jnp.allclose(out, ref_f32, atol=5e-2, rtol=5e-2), (
        float(jnp.max(jnp.abs(out - ref_f32))))

    print("KERNEL_OK")
</pallas_src>

<mosaic_0001>
module attributes {stable_mosaic.version = 11 : i64} {
  func.func @_mlp_kernel(%arg0: i32, %arg1: memref<8x3xf32, #tpu.memory_space<vmem>>, %arg2: memref<3x512xf32, #tpu.memory_space<vmem>>, %arg3: memref<1x512xf32, #tpu.memory_space<vmem>>, %arg4: memref<512x512xbf16, #tpu.memory_space<vmem>>, %arg5: memref<1x512xf32, #tpu.memory_space<vmem>>, %arg6: memref<512x512xbf16, #tpu.memory_space<vmem>>, %arg7: memref<1x512xf32, #tpu.memory_space<vmem>>, %arg8: memref<512x512xbf16, #tpu.memory_space<vmem>>, %arg9: memref<1x512xf32, #tpu.memory_space<vmem>>, %arg10: memref<512x128xbf16, #tpu.memory_space<vmem>>, %arg11: memref<1x128xf32, #tpu.memory_space<vmem>>, %arg12: memref<8x128xf32, #tpu.memory_space<vmem>>) attributes {dimension_semantics = [#tpu.dimension_semantics<parallel>], iteration_bounds = array<i64: 2>, scalar_prefetch = 0 : i64, scratch_operands = 0 : i64, tpu.core_type = #tpu.core_type<tc>, window_params = [{transform_indices = @transform_0, window_bounds = array<i64: 8, 3>}, {pipeline_mode = #tpu.pipeline_mode<synchronous>, transform_indices = @transform_1, window_bounds = array<i64: 3, 512>}, {pipeline_mode = #tpu.pipeline_mode<synchronous>, transform_indices = @transform_2, window_bounds = array<i64: 1, 512>}, {pipeline_mode = #tpu.pipeline_mode<synchronous>, transform_indices = @transform_3, window_bounds = array<i64: 512, 512>}, {pipeline_mode = #tpu.pipeline_mode<synchronous>, transform_indices = @transform_4, window_bounds = array<i64: 1, 512>}, {pipeline_mode = #tpu.pipeline_mode<synchronous>, transform_indices = @transform_5, window_bounds = array<i64: 512, 512>}, {pipeline_mode = #tpu.pipeline_mode<synchronous>, transform_indices = @transform_6, window_bounds = array<i64: 1, 512>}, {pipeline_mode = #tpu.pipeline_mode<synchronous>, transform_indices = @transform_7, window_bounds = array<i64: 512, 512>}, {pipeline_mode = #tpu.pipeline_mode<synchronous>, transform_indices = @transform_8, window_bounds = array<i64: 1, 512>}, {pipeline_mode = #tpu.pipeline_mode<synchronous>, transform_indices = @transform_9, window_bounds = array<i64: 512, 128>}, {pipeline_mode = #tpu.pipeline_mode<synchronous>, transform_indices = @transform_10, window_bounds = array<i64: 1, 128>}, {transform_indices = @transform_11, window_bounds = array<i64: 8, 128>}]} {
    %c0 = arith.constant 0 : index
    %c0_0 = arith.constant 0 : index
    %0 = vector.load %arg1[%c0, %c0_0] : memref<8x3xf32, #tpu.memory_space<vmem>>, vector<8x3xf32>
    %c0_1 = arith.constant 0 : index
    %c0_2 = arith.constant 0 : index
    %1 = vector.load %arg2[%c0_1, %c0_2] : memref<3x512xf32, #tpu.memory_space<vmem>>, vector<3x512xf32>
    %2 = vector.extract_strided_slice %0 {offsets = [0, 0], sizes = [8, 1], strides = [1, 1]} : vector<8x3xf32> to vector<8x1xf32>
    %3 = vector.extract_strided_slice %1 {offsets = [0, 0], sizes = [1, 512], strides = [1, 1]} : vector<3x512xf32> to vector<1x512xf32>
    %4 = vector.broadcast %2 : vector<8x1xf32> to vector<8x512xf32>
    %5 = vector.broadcast %3 : vector<1x512xf32> to vector<8x512xf32>
    %6 = arith.mulf %4, %5 : vector<8x512xf32>
    %7 = vector.extract_strided_slice %0 {offsets = [0, 1], sizes = [8, 1], strides = [1, 1]} : vector<8x3xf32> to vector<8x1xf32>
    %8 = vector.extract_strided_slice %1 {offsets = [1, 0], sizes = [1, 512], strides = [1, 1]} : vector<3x512xf32> to vector<1x512xf32>
    %9 = vector.broadcast %7 : vector<8x1xf32> to vector<8x512xf32>
    %10 = vector.broadcast %8 : vector<1x512xf32> to vector<8x512xf32>
    %11 = arith.mulf %9, %10 : vector<8x512xf32>
    %12 = arith.addf %6, %11 : vector<8x512xf32>
    %13 = vector.extract_strided_slice %0 {offsets = [0, 2], sizes = [8, 1], strides = [1, 1]} : vector<8x3xf32> to vector<8x1xf32>
    %14 = vector.extract_strided_slice %1 {offsets = [2, 0], sizes = [1, 512], strides = [1, 1]} : vector<3x512xf32> to vector<1x512xf32>
    %15 = vector.broadcast %13 : vector<8x1xf32> to vector<8x512xf32>
    %16 = vector.broadcast %14 : vector<1x512xf32> to vector<8x512xf32>
    %17 = arith.mulf %15, %16 : vector<8x512xf32>
    %18 = arith.addf %12, %17 : vector<8x512xf32>
    %c0_3 = arith.constant 0 : index
    %c0_4 = arith.constant 0 : index
    %19 = vector.load %arg3[%c0_3, %c0_4] : memref<1x512xf32, #tpu.memory_space<vmem>>, vector<1x512xf32>
    %20 = vector.broadcast %19 : vector<1x512xf32> to vector<8x512xf32>
    %21 = arith.addf %18, %20 : vector<8x512xf32>
    %cst = arith.constant 0.000000e+00 : f32
    %22 = vector.broadcast %cst : f32 to vector<8x512xf32>
    %23 = arith.maximumf %21, %22 : vector<8x512xf32>
    %24 = arith.truncf %23 : vector<8x512xf32> to vector<8x512xbf16>
    %c0_5 = arith.constant 0 : index
    %c0_6 = arith.constant 0 : index
    %25 = vector.load %arg4[%c0_5, %c0_6] : memref<512x512xbf16, #tpu.memory_space<vmem>>, vector<512x512xbf16>
    %cst_7 = arith.constant dense<0.000000e+00> : vector<8x512xf32>
    %26 = tpu.matmul %24, %25, %cst_7 {dimension_numbers = #tpu.dot_dimension_numbers<[1], [0], [0], [1], [0, 0, 1, 1], [], []>} : vector<8x512xbf16>, vector<512x512xbf16>, vector<8x512xf32> -> vector<8x512xf32>
    %c0_8 = arith.constant 0 : index
    %c0_9 = arith.constant 0 : index
    %27 = vector.load %arg5[%c0_8, %c0_9] : memref<1x512xf32, #tpu.memory_space<vmem>>, vector<1x512xf32>
    %28 = vector.broadcast %27 : vector<1x512xf32> to vector<8x512xf32>
    %29 = arith.addf %26, %28 : vector<8x512xf32>
    %cst_10 = arith.constant 0.000000e+00 : f32
    %30 = vector.broadcast %cst_10 : f32 to vector<8x512xf32>
    %31 = arith.maximumf %29, %30 : vector<8x512xf32>
    %32 = arith.truncf %31 : vector<8x512xf32> to vector<8x512xbf16>
    %c0_11 = arith.constant 0 : index
    %c0_12 = arith.constant 0 : index
    %33 = vector.load %arg6[%c0_11, %c0_12] : memref<512x512xbf16, #tpu.memory_space<vmem>>, vector<512x512xbf16>
    %cst_13 = arith.constant dense<0.000000e+00> : vector<8x512xf32>
    %34 = tpu.matmul %32, %33, %cst_13 {dimension_numbers = #tpu.dot_dimension_numbers<[1], [0], [0], [1], [0, 0, 1, 1], [], []>} : vector<8x512xbf16>, vector<512x512xbf16>, vector<8x512xf32> -> vector<8x512xf32>
    %c0_14 = arith.constant 0 : index
    %c0_15 = arith.constant 0 : index
    %35 = vector.load %arg7[%c0_14, %c0_15] : memref<1x512xf32, #tpu.memory_space<vmem>>, vector<1x512xf32>
    %36 = vector.broadcast %35 : vector<1x512xf32> to vector<8x512xf32>
    %37 = arith.addf %34, %36 : vector<8x512xf32>
    %cst_16 = arith.constant 0.000000e+00 : f32
    %38 = vector.broadcast %cst_16 : f32 to vector<8x512xf32>
    %39 = arith.maximumf %37, %38 : vector<8x512xf32>
    %40 = arith.truncf %39 : vector<8x512xf32> to vector<8x512xbf16>
    %c0_17 = arith.constant 0 : index
    %c0_18 = arith.constant 0 : index
    %41 = vector.load %arg8[%c0_17, %c0_18] : memref<512x512xbf16, #tpu.memory_space<vmem>>, vector<512x512xbf16>
    %cst_19 = arith.constant dense<0.000000e+00> : vector<8x512xf32>
    %42 = tpu.matmul %40, %41, %cst_19 {dimension_numbers = #tpu.dot_dimension_numbers<[1], [0], [0], [1], [0, 0, 1, 1], [], []>} : vector<8x512xbf16>, vector<512x512xbf16>, vector<8x512xf32> -> vector<8x512xf32>
    %c0_20 = arith.constant 0 : index
    %c0_21 = arith.constant 0 : index
    %43 = vector.load %arg9[%c0_20, %c0_21] : memref<1x512xf32, #tpu.memory_space<vmem>>, vector<1x512xf32>
    %44 = vector.broadcast %43 : vector<1x512xf32> to vector<8x512xf32>
    %45 = arith.addf %42, %44 : vector<8x512xf32>
    %cst_22 = arith.constant 0.000000e+00 : f32
    %46 = vector.broadcast %cst_22 : f32 to vector<8x512xf32>
    %47 = arith.maximumf %45, %46 : vector<8x512xf32>
    %48 = arith.truncf %47 : vector<8x512xf32> to vector<8x512xbf16>
    %c0_23 = arith.constant 0 : index
    %c0_24 = arith.constant 0 : index
    %49 = vector.load %arg10[%c0_23, %c0_24] : memref<512x128xbf16, #tpu.memory_space<vmem>>, vector<512x128xbf16>
    %cst_25 = arith.constant dense<0.000000e+00> : vector<8x128xf32>
    %50 = tpu.matmul %48, %49, %cst_25 {dimension_numbers = #tpu.dot_dimension_numbers<[1], [0], [0], [1], [0, 0, 1, 1], [], []>} : vector<8x512xbf16>, vector<512x128xbf16>, vector<8x128xf32> -> vector<8x128xf32>
    %c0_26 = arith.constant 0 : index
    %c0_27 = arith.constant 0 : index
    %51 = vector.load %arg11[%c0_26, %c0_27] : memref<1x128xf32, #tpu.memory_space<vmem>>, vector<1x128xf32>
    %52 = vector.broadcast %51 : vector<1x128xf32> to vector<8x128xf32>
    %53 = arith.addf %50, %52 : vector<8x128xf32>
    %c0_28 = arith.constant 0 : index
    %c0_29 = arith.constant 0 : index
    %54 = vector.load %arg12[%c0_28, %c0_29] : memref<8x128xf32, #tpu.memory_space<vmem>>, vector<8x128xf32>
    tpu.vector_store %arg12[%c0_28, %c0_29], %53 {strides = array<i32>} : memref<8x128xf32, #tpu.memory_space<vmem>>, vector<8x128xf32>,
    return
  }
  func.func @transform_0(%arg0: i32) -> (i32, i32) {
    %c0_i32 = arith.constant 0 : i32
    %c0_i32_0 = arith.constant 0 : i32
    return %arg0, %c0_i32 : i32, i32
  }
  func.func @transform_1(%arg0: i32) -> (i32, i32) {
    %c0_i32 = arith.constant 0 : i32
    %c0_i32_0 = arith.constant 0 : i32
    %c0_i32_1 = arith.constant 0 : i32
    return %c0_i32, %c0_i32_0 : i32, i32
  }
  func.func @transform_2(%arg0: i32) -> (i32, i32) {
    %c0_i32 = arith.constant 0 : i32
    %c0_i32_0 = arith.constant 0 : i32
    %c0_i32_1 = arith.constant 0 : i32
    return %c0_i32, %c0_i32_0 : i32, i32
  }
  func.func @transform_3(%arg0: i32) -> (i32, i32) {
    %c0_i32 = arith.constant 0 : i32
    %c0_i32_0 = arith.constant 0 : i32
    %c0_i32_1 = arith.constant 0 : i32
    return %c0_i32, %c0_i32_0 : i32, i32
  }
  func.func @transform_4(%arg0: i32) -> (i32, i32) {
    %c0_i32 = arith.constant 0 : i32
    %c0_i32_0 = arith.constant 0 : i32
    %c0_i32_1 = arith.constant 0 : i32
    return %c0_i32, %c0_i32_0 : i32, i32
  }
  func.func @transform_5(%arg0: i32) -> (i32, i32) {
    %c0_i32 = arith.constant 0 : i32
    %c0_i32_0 = arith.constant 0 : i32
    %c0_i32_1 = arith.constant 0 : i32
    return %c0_i32, %c0_i32_0 : i32, i32
  }
  func.func @transform_6(%arg0: i32) -> (i32, i32) {
    %c0_i32 = arith.constant 0 : i32
    %c0_i32_0 = arith.constant 0 : i32
    %c0_i32_1 = arith.constant 0 : i32
    return %c0_i32, %c0_i32_0 : i32, i32
  }
  func.func @transform_7(%arg0: i32) -> (i32, i32) {
    %c0_i32 = arith.constant 0 : i32
    %c0_i32_0 = arith.constant 0 : i32
    %c0_i32_1 = arith.constant 0 : i32
    return %c0_i32, %c0_i32_0 : i32, i32
  }
  func.func @transform_8(%arg0: i32) -> (i32, i32) {
    %c0_i32 = arith.constant 0 : i32
    %c0_i32_0 = arith.constant 0 : i32
    %c0_i32_1 = arith.constant 0 : i32
    return %c0_i32, %c0_i32_0 : i32, i32
  }
  func.func @transform_9(%arg0: i32) -> (i32, i32) {
    %c0_i32 = arith.constant 0 : i32
    %c0_i32_0 = arith.constant 0 : i32
    %c0_i32_1 = arith.constant 0 : i32
    return %c0_i32, %c0_i32_0 : i32, i32
  }
  func.func @transform_10(%arg0: i32) -> (i32, i32) {
    %c0_i32 = arith.constant 0 : i32
    %c0_i32_0 = arith.constant 0 : i32
    %c0_i32_1 = arith.constant 0 : i32
    return %c0_i32, %c0_i32_0 : i32, i32
  }
  func.func @transform_11(%arg0: i32) -> (i32, i32) {
    %c0_i32 = arith.constant 0 : i32
    %c0_i32_0 = arith.constant 0 : i32
    return %arg0, %c0_i32 : i32, i32
  }
}

</mosaic_0001>

<bundles_post_ra>
// kernel: pose_interpolator_forward.1
= control target key start
LH: loop header
LB: loop body
LE: loop exit
PB: predicated region body
PF: predicated region fallthrough
CT: control target
= control target key end

     0   :  { %16 = vsyncpa [#allocation3], 0  ;;  %s5581_s0 = inlined_call_operand.vmem [shape: f32[16,3], index: 0, kind: input, shape index: {}]   ;;  %s5582_s1 = inlined_call_operand.vmem [shape: f32[3,512], index: 1, kind: input, shape index: {}]   ;;  %s5583_s2 = inlined_call_operand.vmem [shape: f32[1,512], index: 2, kind: input, shape index: {}]   ;;  %s5584_s3 = inlined_call_operand.hbm [shape: bf16[512,512], index: 3, kind: input, shape index: {}]   ;;  %s5585_s4 = inlined_call_operand.vmem [shape: f32[1,512], index: 4, kind: input, shape index: {}]   ;;  %s5586_s5 = inlined_call_operand.hbm [shape: bf16[512,512], index: 5, kind: input, shape index: {}]   ;;  %s5587_s6 = inlined_call_operand.vmem [shape: f32[1,512], index: 6, kind: input, shape index: {}]   ;;  %s5588_s7 = inlined_call_operand.hbm [shape: bf16[512,512], index: 7, kind: input, shape index: {}]   ;;  %s5589_s8 = inlined_call_operand.vmem [shape: f32[1,512], index: 8, kind: input, shape index: {}]   ;;  %s5590_s9 = inlined_call_operand.hbm [shape: bf16[512,128], index: 9, kind: input, shape index: {}]   ;;  %s5591_s10 = inlined_call_operand.vmem [shape: f32[1,128], index: 10, kind: input, shape index: {}]   ;;  %s5592_s11 = inlined_call_operand.vmem [shape: f32[16,128], index: 11, kind: output, shape index: {}]  }
   0x1   :  { %17 = vsyncpa [#allocation5], 0 }
   0x2   :  { %18 = vsyncpa [#allocation8], 0  ;;  %s5331_s17 = smov 0  }
   0x3 LB: > { %5596 = sst [smem:[#allocation12_spill]] %s5258_s17  ;;  %s5337_s18 = sadd.s32 4294967295, %s5258_s17   ;;  %s5258_s17 = sphi %s5331_s17, %s24_s17  }
   0x4   : > { %p3948_p0 = scmp.ge.s32.totalorder %s5258_s17, 1  ;;  %p291_p1 = scmp.lt.s32.totalorder %s5258_s17, 3 }
   0x5   : > { %p5594_p2 = scmp.eq.s32.totalorder %s5337_s18, 0  ;;  %s5260_s20 = smov [#allocation4]  }
   0x6   : > { %p5342_p3 = pnand %p3948_p0, %p291_p1  ;;  %s325_s21 = sshll.u32 %s5260_s20, 4  ;;  %s5346_s21 = int_to_ptr.vmem [resolvable:$true] %s325_s21 }
   0x7   : > { %s5261_s22 = smov [#allocation2]   ;;  %s5262_s25 = smov [#allocation6]  }
   0x8   : > { %s5597_s19 = scalar_select %p5342_p3, 1, 0 }
   0x9   : > { %p4476_p4 = pneg %p5342_p3  ;;  %s309_s23 = sshll.u32 %s5261_s22, 4  ;;  %s5350_s23 = int_to_ptr.vmem [resolvable:$true] %s309_s23 }
   0xa   : > { %s341_s26 = sshll.u32 %s5262_s25, 4  ;;  %s5263_s27 = smov [#allocation7]   ;;  %s5358_s26 = int_to_ptr.vmem [resolvable:$true] %s341_s26 }
   0xb   : > { %p5354_p5 = pnand %p5594_p2, %p4476_p4  ;;  %s5360_s28 = sshll.u32 %s5263_s27, 4  ;;  %s358_s28 = int_to_ptr.vmem [resolvable:$true] %s5360_s28 }
   0xc   : > { %s5128_s12 = scalar_lea.hbm %s5586_s5, 16384 }
   0xd   : > { %p5129_p6 = scmp.ne.s32.totalorder %s5586_s5, %s5128_s12  ;;  %p5370_p7 = pneg %p5354_p5 }
   0xe   : > { %p5135_p10 = scmp.lt.u32.totalorder %s5128_s12, %s5586_s5 }
   0xf   : > { %p5131_p8 = pnand %p5370_p7, %p5129_p6 }
  0x11   : > { %p5132_p9 = pneg %p5131_p8 }
  0x13   : > { %p5137_p11 = pnand %p5135_p10, %p5132_p9 }
  0x15   : > { %5140 = shalt.err (!%p5137_p11)
}
  0x16   : > { %s5141_s22 = scalar_lea.vmem %s5346_s21, 16384  ;;  %p5149_p1 = scmp.lt.s32.totalorder %s5346_s21, %s5346_s21 }
  0x17   : > { %p5142_p12 = scmp.ne.s32.totalorder %s5346_s21, %s5141_s22  ;;  %p5150_p4 = scmp.lt.s32.totalorder %s5141_s22, %s5141_s22 }
  0x19   : > { %p5144_p13 = pnand %p5142_p12, %p5370_p7  ;;  %p5151_p6 = por %p5150_p4, %p5149_p1 }
  0x1b   : > { %p5145_p0 = pneg %p5144_p13 }
  0x1d   : > { %p5152_p8 = pnand %p5151_p6, %p5145_p0 }
  0x1f   : > { %5155 = shalt.err (!%p5152_p8)
}
  0x20   : > { %s5264_s25 = smov 256   ;;  %s5265_s27 = smov 16  }
  0x21   : > { %4482 = dma.hbm_to_vmem [thread:$0]  (!%p5354_p5), %s5586_s5, 16384, %s5346_s21, [#allocation5], %s5264_s25, %s5264_s25, %s5265_s27  }
  0x22   : > { %s5156_s14 = scalar_lea.hbm %s5584_s3, 16384 }
  0x23   : > { %p5157_p9 = scmp.ne.s32.totalorder %s5584_s3, %s5156_s14  ;;  %p5163_p12 = scmp.lt.u32.totalorder %s5156_s14, %s5584_s3 }
  0x25   : > { %p5159_p10 = pnand %p5157_p9, %p5370_p7 }
  0x27   : > { %p5160_p11 = pneg %p5159_p10 }
  0x29   : > { %p5165_p13 = pnand %p5163_p12, %p5160_p11 }
  0x2b   : > { %5168 = shalt.err (!%p5165_p13)
}
  0x2c   : > { %s5169_s21 = scalar_lea.vmem %s5350_s23, 16384  ;;  %p5177_p6 = scmp.lt.s32.totalorder %s5350_s23, %s5350_s23 }
  0x2d   : > { %p5170_p0 = scmp.ne.s32.totalorder %s5350_s23, %s5169_s21  ;;  %p5178_p8 = scmp.lt.s32.totalorder %s5169_s21, %s5169_s21 }
  0x2f   : > { %p5172_p1 = pnand %p5170_p0, %p5370_p7  ;;  %p5179_p9 = por %p5178_p8, %p5177_p6 }
  0x31   : > { %p5173_p4 = pneg %p5172_p1 }
  0x33   : > { %p5180_p10 = pnand %p5179_p9, %p5173_p4 }
  0x35   : > { %5183 = shalt.err (!%p5180_p10)
}
  0x36   : > { %4479 = dma.hbm_to_vmem [thread:$0]  (!%p5354_p5), %s5584_s3, 16384, %s5350_s23, [#allocation3], %s5264_s25, %s5264_s25, %s5265_s27  }
  0x37   : > { %s5184_s13 = scalar_lea.hbm %s5588_s7, 16384 }
  0x38   : > { %p5185_p11 = scmp.ne.s32.totalorder %s5588_s7, %s5184_s13  ;;  %p5191_p0 = scmp.lt.u32.totalorder %s5184_s13, %s5588_s7 }
  0x3a   : > { %p5187_p12 = pnand %p5185_p11, %p5370_p7 }
  0x3c   : > { %p5188_p13 = pneg %p5187_p12 }
  0x3e   : > { %p5193_p1 = pnand %p5191_p0, %p5188_p13 }
  0x40   : > { %5196 = shalt.err (!%p5193_p1)
}
  0x41   : > { %s5197_s23 = scalar_lea.vmem %s5358_s26, 16384  ;;  %p5205_p9 = scmp.lt.s32.totalorder %s5358_s26, %s5358_s26 }
  0x42   : > { %p5198_p4 = scmp.ne.s32.totalorder %s5358_s26, %s5197_s23  ;;  %p5206_p10 = scmp.lt.s32.totalorder %s5197_s23, %s5197_s23 }
  0x44   : > { %p5200_p6 = pnand %p5198_p4, %p5370_p7  ;;  %p5207_p11 = por %p5206_p10, %p5205_p9 }
  0x46   : > { %p5201_p8 = pneg %p5200_p6 }
  0x48   : > { %p5208_p12 = pnand %p5207_p11, %p5201_p8 }
  0x4a   : > { %5211 = shalt.err (!%p5208_p12)
}
  0x4b   : > { %4485 = dma.hbm_to_vmem [thread:$0]  (!%p5354_p5), %s5588_s7, 16384, %s5358_s26, [#allocation5], %s5264_s25, %s5264_s25, %s5265_s27  }
  0x4c   : > { %s5212_s12 = scalar_lea.hbm %s5590_s9, 4096 }
  0x4d   : > { %p5213_p13 = scmp.ne.s32.totalorder %s5590_s9, %s5212_s12  ;;  %p5219_p4 = scmp.lt.u32.totalorder %s5212_s12, %s5590_s9 }
  0x4f   : > { %p5215_p0 = pnand %p5213_p13, %p5370_p7 }
  0x51   : > { %p5216_p1 = pneg %p5215_p0 }
  0x53   : > { %p5221_p6 = pnand %p5219_p4, %p5216_p1 }
  0x55   : > { %5224 = shalt.err (!%p5221_p6)
}
  0x56   : > { %s5225_s22 = scalar_lea.vmem %s358_s28, 4096  ;;  %p5233_p11 = scmp.lt.s32.totalorder %s358_s28, %s358_s28 }
  0x57   : > { %p5226_p8 = scmp.ne.s32.totalorder %s358_s28, %s5225_s22  ;;  %p5234_p12 = scmp.lt.s32.totalorder %s5225_s22, %s5225_s22 }
  0x59   : > { %p5228_p9 = pnand %p5226_p8, %p5370_p7  ;;  %p5235_p2 = por %p5234_p12, %p5233_p11 }
  0x5b   : > { %p5229_p10 = pneg %p5228_p9 }
  0x5d   : > { %p5236_p3 = pnand %p5235_p2, %p5229_p10 }
  0x5f   : > { %5239 = shalt.err (!%p5236_p3)
}
  0x60   : > { %s5266_s26 = smov 64   ;;  %s5267_s25 = smov 4  }
  0x61   : > { %4488 = dma.hbm_to_vmem [thread:$0]  (!%p5354_p5), %s5590_s9, 4096, %s358_s28, [#allocation8], %s5266_s26, %s5266_s26, %s5267_s25  }
  0x62   : > { %p5600_p13 = scmp.ne.s32.totalorder %s5597_s19, 0 }
  0x63   : > { %p5601_p0 = scmp.eq.s32.totalorder (!%p5600_p13), %s5337_s18, 0 }
  0x64   : > { %383 = sbr.rel (%p5600_p13) target bundleno = 1338 (0x53a), region = 64 }
  0x6b   : > { %5245 = dma.done.wait (%p5601_p0), [#allocation3], 16384   ;;  %p5602_p7 = pmov %p5601_p0 }
  0x6c   : > { %p5603_p2 = pmov %p5601_p0 }
  0x6d   : > { %5247 = vsyncadd (%p5602_p7), [#allocation3], 4294950912 }
  0x6e   : > { %5249 = dma.done.wait (%p5603_p2), [#allocation5], 32768   ;;  %p5604_p3 = pmov %p5601_p0 }
  0x6f   : > { %p5605_p1 = pmov %p5601_p0 }
  0x70   : > { %5251 = vsyncadd (%p5604_p3), [#allocation5], 4294934528 }
  0x71   : > { %5253 = dma.done.wait (%p5605_p1), [#allocation8], 4096   ;;  %p5606_p5 = pmov %p5601_p0 }
  0x72   : > { %p433_p4 = scmp.lt.s32.totalorder %s5337_s18, 1  ;;  %v5268_v0 = vmov 0   ;;  %v5269_v1 = vmov 2   ;;  %v4520_v3 = vld [vmem:[#allocation2 + $0x4] ss:$16 sps:$4 sm:$0xff]   ;;  %v5270_v9 = vmov 1  }
  0x73   : > { %5255 = vsyncadd (%p5606_p5), [#allocation8], 4294963200  ;;  %4516 = vset.pattern.permute.xlu0 %v5268_v0  ;;  %4518 = vset.pattern.permute.xlu1 %v5269_v1  ;;  %v4522_v4 = vld [vmem:[#allocation2 + $0xc] ss:$16 sps:$4 sm:$0xff]   ;;  %v4524_v5 = vld [vmem:[#allocation2] ss:$16 sps:$4 sm:$0xff]  }
  0x74   : > { %s5609_s18 = smov (!%p433_p4, %s5337_s18), 1  ;;  %v4525_v6 = vld [vmem:[#allocation2 + $0x8] ss:$16 sps:$4 sm:$0xff]   ;;  %1412 = vmatprep.subr.bf16.mxu0 %v4520_v3  ;;  %v4526_v7 = vld [vmem:[#allocation2 + $0x24] ss:$16 sps:$4 sm:$0xff]   ;;  %1494 = vmatprep.subr.bf16.mxu1 %v4522_v4 }
  0x75   : > { %s3959_s19 = sshll.u32 %s5609_s18, 3  ;;  %1413 = vmatpush1.bf16.msra.mxu0 %v4524_v5  ;;  %v4528_v8 = vld [vmem:[#allocation2 + $0x2c] ss:$16 sps:$4 sm:$0xff]   ;;  %1495 = vmatpush1.bf16.msra.mxu1 %v4525_v6  ;;  %v4530_v10 = vld [vmem:[#allocation2 + $0x20] ss:$16 sps:$4 sm:$0xff]   ;;  %v452_v6 = vlaneseq }
  0x76   : > { %s436_s15 = scalar_lea.vmem %s5581_s0, %s3959_s19  ;;  %v4531_v11 = vld [vmem:[#allocation2 + $0x28] ss:$16 sps:$4 sm:$0xff]   ;;  %1414 = vmatprep.subr.bf16.mxu0 %v4526_v7  ;;  %v4532_v12 = vld [vmem:[#allocation2 + $0x44] ss:$16 sps:$4 sm:$0xff]   ;;  %1496 = vmatprep.subr.bf16.mxu1 %v4528_v8  ;;  %v4534_v13 = vld [vmem:[#allocation2 + $0x4c] ss:$16 sps:$4 sm:$0xff]  }
  0x77   : > { %v442_v2 = vld [vmem:[%s436_s15] sm:$0xff]  ;;  %v4537_v15 = vld [vmem:[#allocation2 + $0x48] ss:$16 sps:$4 sm:$0xff]   ;;  %v4540_v17 = vld [vmem:[#allocation2 + $0x6c] ss:$16 sps:$4 sm:$0xff]   ;;  %v453_v7 = vshrl.u32 %v452_v6, 7  ;;  %s440_s15 = scalar_lea.vmem %s5592_s11, %s3959_s19 }
  0x78   : > { %447 = vperm.xlu0 %4516, %v442_v2   ;;  %541 = vperm.xlu1 %4518, %v442_v2   ;;  %v4536_v14 = vld [vmem:[#allocation2 + $0x40] ss:$16 sps:$4 sm:$0xff]   ;;  %v4538_v16 = vld [vmem:[#allocation2 + $0x64] ss:$16 sps:$4 sm:$0xff]   ;;  %v4543_v19 = vld [vmem:[#allocation2 + $0x68] ss:$16 sps:$4 sm:$0xff]  }
  0x79   : > { %1415 = vmatpush1.bf16.msra.mxu0 %v4530_v10  ;;  %1497 = vmatpush1.bf16.msra.mxu1 %v4531_v11  ;;  %v4542_v18 = vld [vmem:[#allocation2 + $0x60] ss:$16 sps:$4 sm:$0xff]   ;;  %v4544_v20 = vld [vmem:[#allocation2 + $0x84] ss:$16 sps:$4 sm:$0xff]   ;;  %v4546_v21 = vld [vmem:[#allocation2 + $0x8c] ss:$16 sps:$4 sm:$0xff]  }
  0x7a   : > { %1416 = vmatprep.subr.bf16.mxu0 %v4532_v12  ;;  %1498 = vmatprep.subr.bf16.mxu1 %v4534_v13  ;;  %v4548_v22 = vld [vmem:[#allocation2 + $0x80] ss:$16 sps:$4 sm:$0xff]   ;;  %v4549_v23 = vld [vmem:[#allocation2 + $0x88] ss:$16 sps:$4 sm:$0xff]   ;;  %v4550_v24 = vld [vmem:[#allocation2 + $0xa4] ss:$16 sps:$4 sm:$0xff]  }
  0x7b   : > { %v4552_v25 = vld [vmem:[#allocation2 + $0xac] ss:$16 sps:$4 sm:$0xff]   ;;  %v4554_v26 = vld [vmem:[#allocation2 + $0xa0] ss:$16 sps:$4 sm:$0xff]   ;;  %v4555_v27 = vld [vmem:[#allocation2 + $0xa8] ss:$16 sps:$4 sm:$0xff]  }
  0x7c   : > { %4517 = vset.pattern.permute.xlu0 %v5270_v9  ;;  %v4556_v28 = vld [vmem:[#allocation2 + $0xc4] ss:$16 sps:$4 sm:$0xff]   ;;  %v4558_v29 = vld [vmem:[#allocation2 + $0xcc] ss:$16 sps:$4 sm:$0xff]   ;;  %v4560_v30 = vld [vmem:[#allocation2 + $0xc0] ss:$16 sps:$4 sm:$0xff]  }
  0x7d   : > { %493 = vperm.xlu0 %4517, %v442_v2   ;;  %1417 = vmatpush1.bf16.msra.mxu0 %v4536_v14  ;;  %v4561_v31 = vld [vmem:[#allocation2 + $0xc8] ss:$16 sps:$4 sm:$0xff]   ;;  %v4562_v32 = vld [vmem:[#allocation2 + $0xe4] ss:$16 sps:$4 sm:$0xff]   ;;  %v4564_v33 = vld [vmem:[#allocation2 + $0xec] ss:$16 sps:$4 sm:$0xff]  }
  0x7e   : > { %1499 = vmatpush1.bf16.msra.mxu1 %v4537_v15  ;;  %1418 = vmatprep.subr.bf16.mxu0 %v4538_v16  ;;  %v4566_v34 = vld [vmem:[#allocation2 + $0xe0] ss:$16 sps:$4 sm:$0xff]   ;;  %v4567_v35 = vld [vmem:[#allocation2 + $0xe8] ss:$16 sps:$4 sm:$0xff]   ;;  %v4568_v36 = vld [vmem:[#allocation2 + $0x104] ss:$16 sps:$4 sm:$0xff]  }
  0x7f   : > { %1500 = vmatprep.subr.bf16.mxu1 %v4540_v17  ;;  %v4570_v37 = vld [vmem:[#allocation2 + $0x10c] ss:$16 sps:$4 sm:$0xff]   ;;  %v4572_v38 = vld [vmem:[#allocation2 + $0x100] ss:$16 sps:$4 sm:$0xff]   ;;  %v4573_v39 = vld [vmem:[#allocation2 + $0x108] ss:$16 sps:$4 sm:$0xff]  }
  0x80   : > { %v4574_v40 = vld [vmem:[#allocation2 + $0x124] ss:$16 sps:$4 sm:$0xff]   ;;  %v4576_v41 = vld [vmem:[#allocation2 + $0x12c] ss:$16 sps:$4 sm:$0xff]   ;;  %v4578_v42 = vld [vmem:[#allocation2 + $0x120] ss:$16 sps:$4 sm:$0xff]  }
  0x81   : > { %4519 = vset.pattern.permute.xlu0 %v5269_v1  ;;  %1419 = vmatpush1.bf16.msra.mxu0 %v4542_v18  ;;  %v4579_v43 = vld [vmem:[#allocation2 + $0x128] ss:$16 sps:$4 sm:$0xff]   ;;  %v4580_v44 = vld [vmem:[#allocation2 + $0x144] ss:$16 sps:$4 sm:$0xff]   ;;  %v4582_v45 = vld [vmem:[#allocation2 + $0x14c] ss:$16 sps:$4 sm:$0xff]  }
  0x82   : > { %1501 = vmatpush1.bf16.msra.mxu1 %v4543_v19  ;;  %1420 = vmatprep.subr.bf16.mxu0 %v4544_v20  ;;  %v4584_v46 = vld [vmem:[#allocation2 + $0x140] ss:$16 sps:$4 sm:$0xff]   ;;  %v4585_v47 = vld [vmem:[#allocation2 + $0x148] ss:$16 sps:$4 sm:$0xff]   ;;  %v4586_v48 = vld [vmem:[#allocation2 + $0x164] ss:$16 sps:$4 sm:$0xff]  }
  0x83   : > { %1502 = vmatprep.subr.bf16.mxu1 %v4546_v21  ;;  %v4588_v49 = vld [vmem:[#allocation2 + $0x16c] ss:$16 sps:$4 sm:$0xff]   ;;  %v4590_v50 = vld [vmem:[#allocation2 + $0x160] ss:$16 sps:$4 sm:$0xff]   ;;  %v4591_v51 = vld [vmem:[#allocation2 + $0x168] ss:$16 sps:$4 sm:$0xff]  }
  0x84   : > { %v4592_v52 = vld [vmem:[#allocation2 + $0x184] ss:$16 sps:$4 sm:$0xff]   ;;  %v4594_v53 = vld [vmem:[#allocation2 + $0x18c] ss:$16 sps:$4 sm:$0xff]   ;;  %v4596_v54 = vld [vmem:[#allocation2 + $0x180] ss:$16 sps:$4 sm:$0xff]  }
  0x85   : > { %1421 = vmatpush1.bf16.msra.mxu0 %v4548_v22  ;;  %v4597_v55 = vld [vmem:[#allocation2 + $0x188] ss:$16 sps:$4 sm:$0xff]   ;;  %v4598_v56 = vld [vmem:[#allocation2 + $0x1a4] ss:$16 sps:$4 sm:$0xff]   ;;  %v4600_v57 = vld [vmem:[#allocation2 + $0x1ac] ss:$16 sps:$4 sm:$0xff]  }
  0x86   : > { %1503 = vmatpush1.bf16.msra.mxu1 %v4549_v23  ;;  %1422 = vmatprep.subr.bf16.mxu0 %v4550_v24  ;;  %v4602_v58 = vld [vmem:[#allocation2 + $0x1a0] ss:$16 sps:$4 sm:$0xff]   ;;  %v4603_v59 = vld [vmem:[#allocation2 + $0x1a8] ss:$16 sps:$4 sm:$0xff]   ;;  %v4604_v60 = vld [vmem:[#allocation2 + $0x1c4] ss:$16 sps:$4 sm:$0xff]  }
  0x87   : > { %1504 = vmatprep.subr.bf16.mxu1 %v4552_v25  ;;  %v4606_v61 = vld [vmem:[#allocation2 + $0x1cc] ss:$16 sps:$4 sm:$0xff]   ;;  %v4608_v62 = vld [vmem:[#allocation2 + $0x1c0] ss:$16 sps:$4 sm:$0xff]   ;;  %v4609_v63 = vld [vmem:[#allocation2 + $0x1c8] ss:$16 sps:$4 sm:$0xff]  }
  0x88   : > { %v4610_v0 = vld [vmem:[#allocation2 + $0x1e4] ss:$16 sps:$4 sm:$0xff]   ;;  %v4612_v1 = vld [vmem:[#allocation2 + $0x1ec] ss:$16 sps:$4 sm:$0xff]   ;;  %v4614_v2 = vld [vmem:[#allocation2 + $0x1e0] ss:$16 sps:$4 sm:$0xff]  }
  0x89   : > { %1423 = vmatpush1.bf16.msra.mxu0 %v4554_v26  ;;  %v4615_v3 = vld [vmem:[#allocation2 + $0x1e8] ss:$16 sps:$4 sm:$0xff]   ;;  %v4618_v4 = vld [vmem:[#allocation2 + $0x204] ss:$16 sps:$4 sm:$0xff]   ;;  %v4621_v5 = vld [vmem:[#allocation2 + $0x20c] ss:$16 sps:$4 sm:$0xff]  }
  0x8a   : > { %1505 = vmatpush1.bf16.msra.mxu1 %v4555_v27  ;;  %1424 = vmatprep.subr.bf16.mxu0 %v4556_v28  ;;  %v5489_v8 = vsub.s32 2, %v453_v7  ;;  %v5491_v9 = vsub.s32 0, %v453_v7  ;;  %v458_v10 = vsub.s32 4, %v453_v7  ;;  %v5493_v11 = vsub.s32 1, %v453_v7  ;;  %v443_v12 = vld [vmem:[%s5582_s1] sm:$0x77] }
  0x8b   : > { %1506 = vmatprep.subr.bf16.mxu1 %v4558_v29  ;;  %v444_v13 = vld [vmem:[%s5582_s1 + $0x8] sm:$0x77]  ;;  %v550_v14 = vsub.s32 6, %v453_v7  ;;  %v502_v15 = vsub.s32 5, %v453_v7 }
  0x8c   : > { %v555_v16 = vrot.slane %v444_v13, %v5489_v8  ;;  %v455_v17 = vrot.slane %v443_v12, %v5491_v9  ;;  %v459_v18 = vrot.slane %v443_v12, %v458_v10  ;;  %v463_v19 = vrot.slane %v444_v13, %v5491_v9 }
  0x8d   : > { %1425 = vmatpush1.bf16.msra.mxu0 %v4560_v30  ;;  %v467_v20 = vrot.slane %v444_v13, %v458_v10  ;;  %v499_v21 = vrot.slane %v443_v12, %v5493_v11  ;;  %v547_v22 = vrot.slane %v443_v12, %v5489_v8  ;;  %v551_v23 = vrot.slane %v443_v12, %v550_v14 }
  0x8e   : > { %1507 = vmatpush1.bf16.msra.mxu1 %v4561_v31  ;;  %1426 = vmatprep.subr.bf16.mxu0 %v4562_v32  ;;  %v559_v24 = vrot.slane %v444_v13, %v550_v14  ;;  %v503_v25 = vrot.slane %v443_v12, %v502_v15  ;;  %v507_v26 = vrot.slane %v444_v13, %v5493_v11  ;;  %v4619_v14 = vld [vmem:[#allocation2 + $0x208] ss:$16 sps:$4 sm:$0xff]  }
  0x8f   : > { %1508 = vmatprep.subr.bf16.mxu1 %v4564_v33  ;;  %v511_v27 = vrot.slane %v444_v13, %v502_v15  ;;  %v575_v28 = vrot.slane %v555_v16, %v5489_v8  ;;  %v475_v29 = vrot.slane %v455_v17, %v5491_v9  ;;  %v479_v30 = vrot.slane %v459_v18, %v5491_v9  ;;  %v4616_v13 = vld [vmem:[#allocation2 + $0x200] ss:$16 sps:$4 sm:$0xff]  }
  0x90   : > { %v483_v31 = vrot.slane %v463_v19, %v5491_v9  ;;  %v487_v32 = vrot.slane %v467_v20, %v5491_v9  ;;  %v4624_v19 = vld [vmem:[#allocation2 + $0x224] ss:$16 sps:$4 sm:$0xff]   ;;  %v4627_v20 = vld [vmem:[#allocation2 + $0x22c] ss:$16 sps:$4 sm:$0xff]  }
  0x91   : > { %1427 = vmatpush1.bf16.msra.mxu0 %v4566_v34 }
  0x92   : > { %1509 = vmatpush1.bf16.msra.mxu1 %v4567_v35  ;;  %1428 = vmatprep.subr.bf16.mxu0 %v4568_v36  ;;  %v519_v35 = vrot.slane %v499_v21, %v5493_v11  ;;  %v567_v36 = vrot.slane %v547_v22, %v5489_v8  ;;  %v4622_v21 = vld [vmem:[#allocation2 + $0x220] ss:$16 sps:$4 sm:$0xff]   ;;  %v4625_v22 = vld [vmem:[#allocation2 + $0x228] ss:$16 sps:$4 sm:$0xff]  }
  0x93   : > { %1510 = vmatprep.subr.bf16.mxu1 %v4570_v37  ;;  %v571_v37 = vrot.slane %v551_v23, %v5489_v8 }
  0x95   : > { %1429 = vmatpush1.bf16.msra.mxu0 %v4572_v38  ;;  %v579_v38 = vrot.slane %v559_v24, %v5489_v8  ;;  %v4630_v24 = vld [vmem:[#allocation2 + $0x244] ss:$16 sps:$4 sm:$0xff]  }
  0x96   : > { %1511 = vmatpush1.bf16.msra.mxu1 %v4573_v39  ;;  %1430 = vmatprep.subr.bf16.mxu0 %v4574_v40  ;;  %v523_v39 = vrot.slane %v503_v25, %v5493_v11  ;;  %v527_v40 = vrot.slane %v507_v26, %v5493_v11  ;;  %v4633_v25 = vld [vmem:[#allocation2 + $0x24c] ss:$16 sps:$4 sm:$0xff]   ;;  %v4628_v26 = vld [vmem:[#allocation2 + $0x240] ss:$16 sps:$4 sm:$0xff]  }
  0x97   : > { %1512 = vmatprep.subr.bf16.mxu1 %v4576_v41  ;;  %v531_v41 = vrot.slane %v511_v27, %v5493_v11  ;;  %v4631_v27 = vld [vmem:[#allocation2 + $0x248] ss:$16 sps:$4 sm:$0xff]  }
  0x99   : > { %1431 = vmatpush1.bf16.msra.mxu0 %v4578_v42 }
  0x9a   : > { %1513 = vmatpush1.bf16.msra.mxu1 %v4579_v43  ;;  %1432 = vmatprep.subr.bf16.mxu0 %v4580_v44  ;;  %v5519_v43 = vsub.s32 3, %v453_v7 }
  0x9b   : > { %1514 = vmatprep.subr.bf16.mxu1 %v4582_v45 }
  0x9d   : > { %1433 = vmatpush1.bf16.msra.mxu0 %v4584_v46 }
  0x9e   : > { %1515 = vmatpush1.bf16.msra.mxu1 %v4585_v47  ;;  %1434 = vmatprep.subr.bf16.mxu0 %v4586_v48  ;;  %v588_v47 = vld [vmem:[%s5583_s2] sm:$0xf] }
  0x9f   : > { %1516 = vmatprep.subr.bf16.mxu1 %v4588_v49 }
  0xa1   : > { %1435 = vmatpush1.bf16.msra.mxu0 %v4590_v50 }
  0xa2   : > { %1517 = vmatpush1.bf16.msra.mxu1 %v4591_v51  ;;  %1436 = vmatprep.subr.bf16.mxu0 %v4592_v52 }
  0xa3   : > { %1518 = vmatprep.subr.bf16.mxu1 %v4594_v53 }
  0xa5   : > { %1437 = vmatpush1.bf16.msra.mxu0 %v4596_v54 }
  0xa6   : > { %1519 = vmatpush1.bf16.msra.mxu1 %v4597_v55  ;;  %1438 = vmatprep.subr.bf16.mxu0 %v4598_v56 }
  0xa7   : > { %1520 = vmatprep.subr.bf16.mxu1 %v4600_v57  ;;  %v601_v57 = vrot.slane %v588_v47, %v5489_v8 }
  0xa9   : > { %1439 = vmatpush1.bf16.msra.mxu0 %v4602_v58  ;;  %v597_v58 = vrot.slane %v588_v47, %v5493_v11 }
  0xaa   : > { %1521 = vmatpush1.bf16.msra.mxu1 %v4603_v59  ;;  %1440 = vmatprep.subr.bf16.mxu0 %v4604_v60  ;;  %v593_v59 = vrot.slane %v588_v47, %v5491_v9  ;;  %v605_v60 = vrot.slane %v588_v47, %v5519_v43  ;;  %v4658_v47 = vld [vmem:[#allocation2 + $0x2e0] ss:$16 sps:$4 sm:$0xff]  }
  0xab   : > { %1522 = vmatprep.subr.bf16.mxu1 %v4606_v61 }
  0xad   : > { %1441 = vmatpush1.bf16.msra.mxu0 %v4608_v62 }
  0xae   : > { %1523 = vmatpush1.bf16.msra.mxu1 %v4609_v63  ;;  %1442 = vmatprep.subr.bf16.mxu0 %v4610_v0 }
  0xaf   : > { %1524 = vmatprep.subr.bf16.mxu1 %v4612_v1 }
  0xb1   : > { %1443 = vmatpush1.bf16.msra.mxu0 %v4614_v2 }
  0xb2   : > { %1525 = vmatpush1.bf16.msra.mxu1 %v4615_v3  ;;  %1453 = vmatprep.subr.bf16.mxu0 %v4618_v4 }
  0xb3   : > { %1535 = vmatprep.subr.bf16.mxu1 %v4621_v5 }
  0xf7   : > { %v448_v33 = vpop.permute.xlu0 %447  ;;  %v542_v34 = vpop.permute.xlu1 %541 }
  0xf8   : > { %v582_v42 = vmul.f32 %v575_v28, %v542_v34  ;;  %v488_v44 = vmul.f32 %v475_v29, %v448_v33  ;;  %v489_v45 = vmul.f32 %v479_v30, %v448_v33  ;;  %v490_v46 = vmul.f32 %v483_v31, %v448_v33  ;;  %v4636_v28 = vld [vmem:[#allocation2 + $0x264] ss:$16 sps:$4 sm:$0xff]   ;;  %v4639_v29 = vld [vmem:[#allocation2 + $0x26c] ss:$16 sps:$4 sm:$0xff]   ;;  %v4634_v30 = vld [vmem:[#allocation2 + $0x260] ss:$16 sps:$4 sm:$0xff]  }
  0xf9   : > { %v491_v48 = vmul.f32 %v487_v32, %v448_v33  ;;  %v580_v50 = vmul.f32 %v567_v36, %v542_v34  ;;  %v581_v51 = vmul.f32 %v571_v37, %v542_v34  ;;  %v583_v52 = vmul.f32 %v579_v38, %v542_v34  ;;  %v4637_v31 = vld [vmem:[#allocation2 + $0x268] ss:$16 sps:$4 sm:$0xff]   ;;  %v4642_v32 = vld [vmem:[#allocation2 + $0x284] ss:$16 sps:$4 sm:$0xff]   ;;  %v4645_v33 = vld [vmem:[#allocation2 + $0x28c] ss:$16 sps:$4 sm:$0xff]  }
  0xfa   : > { %v4640_v34 = vld [vmem:[#allocation2 + $0x280] ss:$16 sps:$4 sm:$0xff]   ;;  %v4648_v36 = vld [vmem:[#allocation2 + $0x2a4] ss:$16 sps:$4 sm:$0xff]   ;;  %v4651_v37 = vld [vmem:[#allocation2 + $0x2ac] ss:$16 sps:$4 sm:$0xff]  }
  0xfb   : > { %v4646_v38 = vld [vmem:[#allocation2 + $0x2a0] ss:$16 sps:$4 sm:$0xff]  }
  0xfc   : > { %v494_v49 = vpop.permute.xlu0 %493 }
  0xfd   : > { %v532_v53 = vmul.f32 %v519_v35, %v494_v49  ;;  %v533_v54 = vmul.f32 %v523_v39, %v494_v49  ;;  %v534_v55 = vmul.f32 %v527_v40, %v494_v49  ;;  %v535_v56 = vmul.f32 %v531_v41, %v494_v49  ;;  %v4643_v35 = vld [vmem:[#allocation2 + $0x288] ss:$16 sps:$4 sm:$0xff]   ;;  %v4654_v40 = vld [vmem:[#allocation2 + $0x2c4] ss:$16 sps:$4 sm:$0xff]   ;;  %v4657_v41 = vld [vmem:[#allocation2 + $0x2cc] ss:$16 sps:$4 sm:$0xff]  }
  0xfe   : > { %v4649_v39 = vld [vmem:[#allocation2 + $0x2a8] ss:$16 sps:$4 sm:$0xff]   ;;  %v4666_v49 = vld [vmem:[#allocation2 + $0x304] ss:$16 sps:$4 sm:$0xff]  }
  0xff   : > { %v536_v61 = vadd.f32 %v532_v53, %v488_v44  ;;  %v537_v62 = vadd.f32 %v533_v54, %v489_v45  ;;  %v538_v63 = vadd.f32 %v534_v55, %v490_v46  ;;  %v539_v0 = vadd.f32 %v535_v56, %v491_v48  ;;  %v4655_v44 = vld [vmem:[#allocation2 + $0x2c8] ss:$16 sps:$4 sm:$0xff]   ;;  %v4660_v45 = vld [vmem:[#allocation2 + $0x2e4] ss:$16 sps:$4 sm:$0xff]   ;;  %v4663_v46 = vld [vmem:[#allocation2 + $0x2ec] ss:$16 sps:$4 sm:$0xff]  }
 0x100   : > { %v4661_v48 = vld [vmem:[#allocation2 + $0x2e8] ss:$16 sps:$4 sm:$0xff]   ;;  %v4672_v53 = vld [vmem:[#allocation2 + $0x324] ss:$16 sps:$4 sm:$0xff]   ;;  %v4675_v54 = vld [vmem:[#allocation2 + $0x32c] ss:$16 sps:$4 sm:$0xff]  }
 0x101   : > { %v584_v1 = vadd.f32 %v580_v50, %v536_v61  ;;  %v586_v2 = vadd.f32 %v582_v42, %v538_v63  ;;  %v587_v3 = vadd.f32 %v583_v52, %v539_v0  ;;  %v585_v4 = vadd.f32 %v581_v51, %v537_v62  ;;  %v4652_v42 = vld [vmem:[#allocation2 + $0x2c0] ss:$16 sps:$4 sm:$0xff]   ;;  %v4669_v50 = vld [vmem:[#allocation2 + $0x30c] ss:$16 sps:$4 sm:$0xff]   ;;  %v4667_v52 = vld [vmem:[#allocation2 + $0x308] ss:$16 sps:$4 sm:$0xff]  }
 0x102   : > { %v4664_v51 = vld [vmem:[#allocation2 + $0x300] ss:$16 sps:$4 sm:$0xff]   ;;  %v4673_v56 = vld [vmem:[#allocation2 + $0x328] ss:$16 sps:$4 sm:$0xff]   ;;  %v4684_v61 = vld [vmem:[#allocation2 + $0x364] ss:$16 sps:$4 sm:$0xff]  }
 0x103   : > { %v5528_v5 = vadd.f32 %v601_v57, %v586_v2  ;;  %v611_v6 = vadd.f32 %v597_v58, %v585_v4  ;;  %v610_v7 = vadd.f32 %v593_v59, %v584_v1  ;;  %v613_v10 = vadd.f32 %v605_v60, %v587_v3  ;;  %v4670_v55 = vld [vmem:[#allocation2 + $0x320] ss:$16 sps:$4 sm:$0xff]   ;;  %v4678_v57 = vld [vmem:[#allocation2 + $0x344] ss:$16 sps:$4 sm:$0xff]   ;;  %v4681_v58 = vld [vmem:[#allocation2 + $0x34c] ss:$16 sps:$4 sm:$0xff]  }
 0x104   : > { %v4676_v59 = vld [vmem:[#allocation2 + $0x340] ss:$16 sps:$4 sm:$0xff]   ;;  %v4679_v60 = vld [vmem:[#allocation2 + $0x348] ss:$16 sps:$4 sm:$0xff]   ;;  %v4687_v62 = vld [vmem:[#allocation2 + $0x36c] ss:$16 sps:$4 sm:$0xff]  }
 0x105   : > { %v615_v12 = vmax.f32 %v611_v6, 0.0  ;;  %v614_v15 = vmax.f32 %v610_v7, 0.0  ;;  %v617_v16 = vmax.f32 %v613_v10, 0.0  ;;  %v4682_v63 = vld [vmem:[#allocation2 + $0x360] ss:$16 sps:$4 sm:$0xff]   ;;  %v616_v10 = vmax.f32 %v5528_v5, 0.0 }
 0x106   : > { %v4685_v0 = vld [vmem:[#allocation2 + $0x368] ss:$16 sps:$4 sm:$0xff]   ;;  %v4690_v1 = vld [vmem:[#allocation2 + $0x384] ss:$16 sps:$4 sm:$0xff]   ;;  %v4693_v2 = vld [vmem:[#allocation2 + $0x38c] ss:$16 sps:$4 sm:$0xff]  }
 0x107   : > { %v619_v17 = vpack.c.bf16 %v615_v12, %v615_v12  ;;  %v618_v18 = vpack.c.bf16 %v614_v15, %v614_v15  ;;  %v621_v23 = vpack.c.bf16 %v617_v16, %v617_v16  ;;  %v4688_v3 = vld [vmem:[#allocation2 + $0x380] ss:$16 sps:$4 sm:$0xff]   ;;  %v4691_v4 = vld [vmem:[#allocation2 + $0x388] ss:$16 sps:$4 sm:$0xff]   ;;  %v4696_v6 = vld [vmem:[#allocation2 + $0x3a4] ss:$16 sps:$4 sm:$0xff]  }
 0x108   : > { %v4699_v7 = vld [vmem:[#allocation2 + $0x3ac] ss:$16 sps:$4 sm:$0xff]   ;;  %v4694_v12 = vld [vmem:[#allocation2 + $0x3a0] ss:$16 sps:$4 sm:$0xff]  }
 0x109   : > { %1444 = vmatprep.mubr.bf16.mxu0 %v619_v17  ;;  %1526 = vmatprep.mubr.bf16.mxu1 %v619_v17  ;;  %v4705_v15 = vld [vmem:[#allocation2 + $0x3cc] ss:$16 sps:$4 sm:$0xff]   ;;  %v4700_v16 = vld [vmem:[#allocation2 + $0x3c0] ss:$16 sps:$4 sm:$0xff]   ;;  %v4703_v17 = vld [vmem:[#allocation2 + $0x3c8] ss:$16 sps:$4 sm:$0xff]  }
 0x10a   : > { %1445 = vmatmul.mubr.bf16.vlgmr.msra.gmra.mrb[0].mxu0 %v618_v18  ;;  %1527 = vmatmul.mubr.bf16.vlgmr.msra.gmra.mrb[0].mxu1 %v618_v18  ;;  %v4708_v18 = vld [vmem:[#allocation2 + $0x3e4] ss:$16 sps:$4 sm:$0xff]   ;;  %v4706_v5 = vld [vmem:[#allocation2 + $0x3e0] ss:$16 sps:$4 sm:$0xff]  }
 0x10b   : > { %1454 = vmatpush1.bf16.msra.mxu0 %v4616_v13  ;;  %1536 = vmatpush1.bf16.msra.mxu1 %v4619_v14  ;;  %v4697_v13 = vld [vmem:[#allocation2 + $0x3a8] ss:$16 sps:$4 sm:$0xff]   ;;  %v4702_v14 = vld [vmem:[#allocation2 + $0x3c4] ss:$16 sps:$4 sm:$0xff]  }
 0x10c   : > { %1485 = vmatprep.mubr.bf16.mxu0 %v621_v23  ;;  %1567 = vmatprep.mubr.bf16.mxu1 %v621_v23  ;;  %v4712_v23 = vld [vmem:[#allocation4] ss:$16 sps:$4 sm:$0xff]  }
 0x10d   : > { %1455 = vmatprep.subr.bf16.mxu0 %v4624_v19  ;;  %1537 = vmatprep.subr.bf16.mxu1 %v4627_v20  ;;  %v4711_v19 = vld [vmem:[#allocation2 + $0x3ec] ss:$16 sps:$4 sm:$0xff]   ;;  %v4709_v20 = vld [vmem:[#allocation2 + $0x3e8] ss:$16 sps:$4 sm:$0xff]  }
 0x10f   : > { %1456 = vmatpush1.bf16.msra.mxu0 %v4622_v21  ;;  %1538 = vmatpush1.bf16.msra.mxu1 %v4625_v22  ;;  %v4714_v21 = vld [vmem:[#allocation4 + $0x4] ss:$16 sps:$4 sm:$0xff]   ;;  %v4717_v22 = vld [vmem:[#allocation4 + $0xc] ss:$16 sps:$4 sm:$0xff]  }
 0x110   : > { %1457 = vmatprep.subr.bf16.mxu0 %v4630_v24  ;;  %1539 = vmatprep.subr.bf16.mxu1 %v4633_v25  ;;  %v4715_v24 = vld [vmem:[#allocation4 + $0x8] ss:$16 sps:$4 sm:$0xff]   ;;  %v4720_v25 = vld [vmem:[#allocation4 + $0x24] ss:$16 sps:$4 sm:$0xff]  }
 0x113   : > { %1458 = vmatpush1.bf16.msra.mxu0 %v4628_v26  ;;  %1540 = vmatpush1.bf16.msra.mxu1 %v4631_v27  ;;  %v4723_v26 = vld [vmem:[#allocation4 + $0x2c] ss:$16 sps:$4 sm:$0xff]   ;;  %v620_v27 = vpack.c.bf16 %v616_v10, %v616_v10  ;;  %v4786_v10 = vld [vmem:[#allocation4 + $0x184] ss:$16 sps:$4 sm:$0xff]  }
 0x114   : > { %1459 = vmatprep.subr.bf16.mxu0 %v4636_v28  ;;  %1541 = vmatprep.subr.bf16.mxu1 %v4639_v29  ;;  %v4718_v28 = vld [vmem:[#allocation4 + $0x20] ss:$16 sps:$4 sm:$0xff]   ;;  %v4721_v29 = vld [vmem:[#allocation4 + $0x28] ss:$16 sps:$4 sm:$0xff]  }
 0x117   : > { %1460 = vmatpush1.bf16.msra.mxu0 %v4634_v30  ;;  %1542 = vmatpush1.bf16.msra.mxu1 %v4637_v31  ;;  %v4726_v30 = vld [vmem:[#allocation4 + $0x44] ss:$16 sps:$4 sm:$0xff]   ;;  %v4729_v31 = vld [vmem:[#allocation4 + $0x4c] ss:$16 sps:$4 sm:$0xff]  }
 0x118   : > { %1461 = vmatprep.subr.bf16.mxu0 %v4642_v32  ;;  %1543 = vmatprep.subr.bf16.mxu1 %v4645_v33  ;;  %v4724_v32 = vld [vmem:[#allocation4 + $0x40] ss:$16 sps:$4 sm:$0xff]   ;;  %v4727_v33 = vld [vmem:[#allocation4 + $0x48] ss:$16 sps:$4 sm:$0xff]  }
 0x11b   : > { %1462 = vmatpush1.bf16.msra.mxu0 %v4640_v34  ;;  %1544 = vmatpush1.bf16.msra.mxu1 %v4643_v35  ;;  %v4732_v34 = vld [vmem:[#allocation4 + $0x64] ss:$16 sps:$4 sm:$0xff]   ;;  %v4735_v35 = vld [vmem:[#allocation4 + $0x6c] ss:$16 sps:$4 sm:$0xff]  }
 0x11c   : > { %1463 = vmatprep.subr.bf16.mxu0 %v4648_v36  ;;  %1545 = vmatprep.subr.bf16.mxu1 %v4651_v37  ;;  %v4730_v36 = vld [vmem:[#allocation4 + $0x60] ss:$16 sps:$4 sm:$0xff]   ;;  %v4733_v37 = vld [vmem:[#allocation4 + $0x68] ss:$16 sps:$4 sm:$0xff]  }
 0x11f   : > { %1464 = vmatpush1.bf16.msra.mxu0 %v4646_v38  ;;  %1546 = vmatpush1.bf16.msra.mxu1 %v4649_v39  ;;  %v4738_v38 = vld [vmem:[#allocation4 + $0x84] ss:$16 sps:$4 sm:$0xff]   ;;  %v4741_v39 = vld [vmem:[#allocation4 + $0x8c] ss:$16 sps:$4 sm:$0xff]  }
 0x120   : > { %1465 = vmatprep.subr.bf16.mxu0 %v4654_v40  ;;  %1547 = vmatprep.subr.bf16.mxu1 %v4657_v41  ;;  %v4736_v40 = vld [vmem:[#allocation4 + $0x80] ss:$16 sps:$4 sm:$0xff]   ;;  %v4739_v41 = vld [vmem:[#allocation4 + $0x88] ss:$16 sps:$4 sm:$0xff]  }
 0x123   : > { %1466 = vmatpush1.bf16.msra.mxu0 %v4652_v42  ;;  %1548 = vmatpush1.bf16.msra.mxu1 %v4655_v44  ;;  %v4744_v42 = vld [vmem:[#allocation4 + $0xa4] ss:$16 sps:$4 sm:$0xff]   ;;  %v4747_v44 = vld [vmem:[#allocation4 + $0xac] ss:$16 sps:$4 sm:$0xff]  }
 0x124   : > { %1467 = vmatprep.subr.bf16.mxu0 %v4660_v45  ;;  %1549 = vmatprep.subr.bf16.mxu1 %v4663_v46  ;;  %v4742_v45 = vld [vmem:[#allocation4 + $0xa0] ss:$16 sps:$4 sm:$0xff]   ;;  %v4745_v46 = vld [vmem:[#allocation4 + $0xa8] ss:$16 sps:$4 sm:$0xff]  }
 0x127   : > { %1468 = vmatpush1.bf16.msra.mxu0 %v4658_v47  ;;  %1550 = vmatpush1.bf16.msra.mxu1 %v4661_v48  ;;  %v4750_v47 = vld [vmem:[#allocation4 + $0xc4] ss:$16 sps:$4 sm:$0xff]   ;;  %v4753_v48 = vld [vmem:[#allocation4 + $0xcc] ss:$16 sps:$4 sm:$0xff]  }
 0x128   : > { %1469 = vmatprep.subr.bf16.mxu0 %v4666_v49  ;;  %1551 = vmatprep.subr.bf16.mxu1 %v4669_v50  ;;  %v4748_v49 = vld [vmem:[#allocation4 + $0xc0] ss:$16 sps:$4 sm:$0xff]   ;;  %v4751_v50 = vld [vmem:[#allocation4 + $0xc8] ss:$16 sps:$4 sm:$0xff]  }
 0x12b   : > { %1470 = vmatpush1.bf16.msra.mxu0 %v4664_v51  ;;  %1552 = vmatpush1.bf16.msra.mxu1 %v4667_v52  ;;  %v4756_v51 = vld [vmem:[#allocation4 + $0xe4] ss:$16 sps:$4 sm:$0xff]   ;;  %v4759_v52 = vld [vmem:[#allocation4 + $0xec] ss:$16 sps:$4 sm:$0xff]  }
 0x12c   : > { %1471 = vmatprep.subr.bf16.mxu0 %v4672_v53  ;;  %1553 = vmatprep.subr.bf16.mxu1 %v4675_v54  ;;  %v4754_v53 = vld [vmem:[#allocation4 + $0xe0] ss:$16 sps:$4 sm:$0xff]   ;;  %v4757_v54 = vld [vmem:[#allocation4 + $0xe8] ss:$16 sps:$4 sm:$0xff]  }
 0x12f   : > { %1472 = vmatpush1.bf16.msra.mxu0 %v4670_v55  ;;  %1554 = vmatpush1.bf16.msra.mxu1 %v4673_v56  ;;  %v4762_v55 = vld [vmem:[#allocation4 + $0x104] ss:$16 sps:$4 sm:$0xff]   ;;  %v4765_v56 = vld [vmem:[#allocation4 + $0x10c] ss:$16 sps:$4 sm:$0xff]  }
 0x130   : > { %1473 = vmatprep.subr.bf16.mxu0 %v4678_v57  ;;  %1555 = vmatprep.subr.bf16.mxu1 %v4681_v58  ;;  %v4760_v57 = vld [vmem:[#allocation4 + $0x100] ss:$16 sps:$4 sm:$0xff]   ;;  %v4763_v58 = vld [vmem:[#allocation4 + $0x108] ss:$16 sps:$4 sm:$0xff]  }
 0x133   : > { %1474 = vmatpush1.bf16.msra.mxu0 %v4676_v59  ;;  %1556 = vmatpush1.bf16.msra.mxu1 %v4679_v60  ;;  %v4768_v59 = vld [vmem:[#allocation4 + $0x124] ss:$16 sps:$4 sm:$0xff]   ;;  %v4771_v60 = vld [vmem:[#allocation4 + $0x12c] ss:$16 sps:$4 sm:$0xff]  }
 0x134   : > { %1475 = vmatprep.subr.bf16.mxu0 %v4684_v61  ;;  %1557 = vmatprep.subr.bf16.mxu1 %v4687_v62  ;;  %v4766_v61 = vld [vmem:[#allocation4 + $0x120] ss:$16 sps:$4 sm:$0xff]   ;;  %v4769_v62 = vld [vmem:[#allocation4 + $0x128] ss:$16 sps:$4 sm:$0xff]  }
 0x137   : > { %1476 = vmatpush1.bf16.msra.mxu0 %v4682_v63  ;;  %1558 = vmatpush1.bf16.msra.mxu1 %v4685_v0  ;;  %v4774_v63 = vld [vmem:[#allocation4 + $0x144] ss:$16 sps:$4 sm:$0xff]   ;;  %v4777_v0 = vld [vmem:[#allocation4 + $0x14c] ss:$16 sps:$4 sm:$0xff]  }
 0x138   : > { %1477 = vmatprep.subr.bf16.mxu0 %v4690_v1  ;;  %1559 = vmatprep.subr.bf16.mxu1 %v4693_v2  ;;  %v4772_v1 = vld [vmem:[#allocation4 + $0x140] ss:$16 sps:$4 sm:$0xff]   ;;  %v4775_v2 = vld [vmem:[#allocation4 + $0x148] ss:$16 sps:$4 sm:$0xff]  }
 0x13b   : > { %1478 = vmatpush1.bf16.msra.mxu0 %v4688_v3  ;;  %1560 = vmatpush1.bf16.msra.mxu1 %v4691_v4  ;;  %v4780_v3 = vld [vmem:[#allocation4 + $0x164] ss:$16 sps:$4 sm:$0xff]   ;;  %v4783_v4 = vld [vmem:[#allocation4 + $0x16c] ss:$16 sps:$4 sm:$0xff]  }
 0x13c   : > { %1479 = vmatprep.subr.bf16.mxu0 %v4696_v6  ;;  %1561 = vmatprep.subr.bf16.mxu1 %v4699_v7  ;;  %v4778_v6 = vld [vmem:[#allocation4 + $0x160] ss:$16 sps:$4 sm:$0xff]   ;;  %v4781_v7 = vld [vmem:[#allocation4 + $0x168] ss:$16 sps:$4 sm:$0xff]  }
 0x13f   : > { %1480 = vmatpush1.bf16.msra.mxu0 %v4694_v12  ;;  %1562 = vmatpush1.bf16.msra.mxu1 %v4697_v13  ;;  %v4789_v12 = vld [vmem:[#allocation4 + $0x18c] ss:$16 sps:$4 sm:$0xff]   ;;  %v4784_v13 = vld [vmem:[#allocation4 + $0x180] ss:$16 sps:$4 sm:$0xff]  }
 0x140   : > { %1481 = vmatprep.subr.bf16.mxu0 %v4702_v14  ;;  %1563 = vmatprep.subr.bf16.mxu1 %v4705_v15  ;;  %v4787_v14 = vld [vmem:[#allocation4 + $0x188] ss:$16 sps:$4 sm:$0xff]   ;;  %v4792_v15 = vld [vmem:[#allocation4 + $0x1a4] ss:$16 sps:$4 sm:$0xff]  }
 0x143   : > { %1482 = vmatpush1.bf16.msra.mxu0 %v4700_v16  ;;  %1564 = vmatpush1.bf16.msra.mxu1 %v4703_v17  ;;  %v4795_v16 = vld [vmem:[#allocation4 + $0x1ac] ss:$16 sps:$4 sm:$0xff]   ;;  %v4790_v17 = vld [vmem:[#allocation4 + $0x1a0] ss:$16 sps:$4 sm:$0xff]  }
 0x144   : > { %1483 = vmatprep.subr.bf16.mxu0 %v4708_v18  ;;  %1565 = vmatprep.subr.bf16.mxu1 %v4711_v19  ;;  %v4793_v18 = vld [vmem:[#allocation4 + $0x1a8] ss:$16 sps:$4 sm:$0xff]   ;;  %v4798_v19 = vld [vmem:[#allocation4 + $0x1c4] ss:$16 sps:$4 sm:$0xff]  }
 0x147   : > { %1484 = vmatpush1.bf16.msra.mxu0 %v4706_v5  ;;  %1566 = vmatpush1.bf16.msra.mxu1 %v4709_v20  ;;  %v4801_v5 = vld [vmem:[#allocation4 + $0x1cc] ss:$16 sps:$4 sm:$0xff]   ;;  %v4796_v20 = vld [vmem:[#allocation4 + $0x1c0] ss:$16 sps:$4 sm:$0xff]  }
 0x148   : > { %2374 = vmatprep.subr.bf16.mxu0 %v4714_v21  ;;  %2456 = vmatprep.subr.bf16.mxu1 %v4717_v22  ;;  %v4799_v21 = vld [vmem:[#allocation4 + $0x1c8] ss:$16 sps:$4 sm:$0xff]   ;;  %v4804_v22 = vld [vmem:[#allocation4 + $0x1e4] ss:$16 sps:$4 sm:$0xff]  }
 0x14a   : > { %1486 = vmatmul.mubr.bf16.vlgmr.msra.gmra.mrb[0].mxu0 %v620_v27  ;;  %1568 = vmatmul.mubr.bf16.vlgmr.msra.gmra.mrb[0].mxu1 %v620_v27  ;;  %v4813_v27 = vld [vmem:[#allocation4 + $0x20c] ss:$16 sps:$4 sm:$0xff]  }
 0x14b   : > { %2375 = vmatpush1.bf16.msra.mxu0 %v4712_v23  ;;  %2457 = vmatpush1.bf16.msra.mxu1 %v4715_v24  ;;  %v4807_v23 = vld [vmem:[#allocation4 + $0x1ec] ss:$16 sps:$4 sm:$0xff]   ;;  %v4802_v24 = vld [vmem:[#allocation4 + $0x1e0] ss:$16 sps:$4 sm:$0xff]  }
 0x14c   : > { %2376 = vmatprep.subr.bf16.mxu0 %v4720_v25  ;;  %2458 = vmatprep.subr.bf16.mxu1 %v4723_v26  ;;  %v4805_v25 = vld [vmem:[#allocation4 + $0x1e8] ss:$16 sps:$4 sm:$0xff]   ;;  %v4810_v26 = vld [vmem:[#allocation4 + $0x204] ss:$16 sps:$4 sm:$0xff]  }
 0x14f   : > { %2377 = vmatpush1.bf16.msra.mxu0 %v4718_v28  ;;  %2459 = vmatpush1.bf16.msra.mxu1 %v4721_v29  ;;  %v5534_v28 = vld [vmem:[%s5585_s4] sm:$0xf] }
 0x150   : > { %2378 = vmatprep.subr.bf16.mxu0 %v4726_v30  ;;  %2460 = vmatprep.subr.bf16.mxu1 %v4729_v31  ;;  %v755_v29 = vrot.slane %v5534_v28, %v5491_v9  ;;  %v759_v30 = vrot.slane %v5534_v28, %v5493_v11  ;;  %v767_v31 = vrot.slane %v5534_v28, %v5519_v43 }
 0x153   : > { %2379 = vmatpush1.bf16.msra.mxu0 %v4724_v32  ;;  %2461 = vmatpush1.bf16.msra.mxu1 %v4727_v33 }
 0x154   : > { %2380 = vmatprep.subr.bf16.mxu0 %v4732_v34  ;;  %2462 = vmatprep.subr.bf16.mxu1 %v4735_v35 }
 0x157   : > { %2381 = vmatpush1.bf16.msra.mxu0 %v4730_v36  ;;  %2463 = vmatpush1.bf16.msra.mxu1 %v4733_v37 }
 0x158   : > { %2382 = vmatprep.subr.bf16.mxu0 %v4738_v38  ;;  %2464 = vmatprep.subr.bf16.mxu1 %v4741_v39 }
 0x15b   : > { %2383 = vmatpush1.bf16.msra.mxu0 %v4736_v40  ;;  %2465 = vmatpush1.bf16.msra.mxu1 %v4739_v41 }
 0x15c   : > { %2384 = vmatprep.subr.bf16.mxu0 %v4744_v42  ;;  %2466 = vmatprep.subr.bf16.mxu1 %v4747_v44 }
 0x15f   : > { %2385 = vmatpush1.bf16.msra.mxu0 %v4742_v45  ;;  %2467 = vmatpush1.bf16.msra.mxu1 %v4745_v46 }
 0x160   : > { %2386 = vmatprep.subr.bf16.mxu0 %v4750_v47  ;;  %2468 = vmatprep.subr.bf16.mxu1 %v4753_v48  ;;  %v4808_v48 = vld [vmem:[#allocation4 + $0x200] ss:$16 sps:$4 sm:$0xff]  }
 0x163   : > { %2387 = vmatpush1.bf16.msra.mxu0 %v4748_v49  ;;  %2469 = vmatpush1.bf16.msra.mxu1 %v4751_v50  ;;  %v4811_v49 = vld [vmem:[#allocation4 + $0x208] ss:$16 sps:$4 sm:$0xff]  }
 0x164   : > { %2388 = vmatprep.subr.bf16.mxu0 %v4756_v51  ;;  %2470 = vmatprep.subr.bf16.mxu1 %v4759_v52  ;;  %v4816_v51 = vld [vmem:[#allocation4 + $0x224] ss:$16 sps:$4 sm:$0xff]   ;;  %v4819_v52 = vld [vmem:[#allocation4 + $0x22c] ss:$16 sps:$4 sm:$0xff]  }
 0x167   : > { %2389 = vmatpush1.bf16.msra.mxu0 %v4754_v53  ;;  %2471 = vmatpush1.bf16.msra.mxu1 %v4757_v54  ;;  %v4814_v54 = vld [vmem:[#allocation4 + $0x220] ss:$16 sps:$4 sm:$0xff]  }
 0x168   : > { %2390 = vmatprep.subr.bf16.mxu0 %v4762_v55  ;;  %2472 = vmatprep.subr.bf16.mxu1 %v4765_v56  ;;  %v4817_v55 = vld [vmem:[#allocation4 + $0x228] ss:$16 sps:$4 sm:$0xff]   ;;  %v4822_v56 = vld [vmem:[#allocation4 + $0x244] ss:$16 sps:$4 sm:$0xff]  }
 0x16b   : > { %2391 = vmatpush1.bf16.msra.mxu0 %v4760_v57  ;;  %2473 = vmatpush1.bf16.msra.mxu1 %v4763_v58  ;;  %v4825_v57 = vld [vmem:[#allocation4 + $0x24c] ss:$16 sps:$4 sm:$0xff]   ;;  %v4820_v58 = vld [vmem:[#allocation4 + $0x240] ss:$16 sps:$4 sm:$0xff]  }
 0x16c   : > { %2392 = vmatprep.subr.bf16.mxu0 %v4768_v59  ;;  %2474 = vmatprep.subr.bf16.mxu1 %v4771_v60  ;;  %v4823_v59 = vld [vmem:[#allocation4 + $0x248] ss:$16 sps:$4 sm:$0xff]   ;;  %v4828_v60 = vld [vmem:[#allocation4 + $0x264] ss:$16 sps:$4 sm:$0xff]  }
 0x16f   : > { %2393 = vmatpush1.bf16.msra.mxu0 %v4766_v61  ;;  %2475 = vmatpush1.bf16.msra.mxu1 %v4769_v62  ;;  %v4831_v61 = vld [vmem:[#allocation4 + $0x26c] ss:$16 sps:$4 sm:$0xff]   ;;  %v4826_v62 = vld [vmem:[#allocation4 + $0x260] ss:$16 sps:$4 sm:$0xff]  }
 0x170   : > { %2394 = vmatprep.subr.bf16.mxu0 %v4774_v63  ;;  %2476 = vmatprep.subr.bf16.mxu1 %v4777_v0  ;;  %v4829_v63 = vld [vmem:[#allocation4 + $0x268] ss:$16 sps:$4 sm:$0xff]   ;;  %v4834_v0 = vld [vmem:[#allocation4 + $0x284] ss:$16 sps:$4 sm:$0xff]  }
 0x173   : > { %2395 = vmatpush1.bf16.msra.mxu0 %v4772_v1  ;;  %2477 = vmatpush1.bf16.msra.mxu1 %v4775_v2  ;;  %v4837_v1 = vld [vmem:[#allocation4 + $0x28c] ss:$16 sps:$4 sm:$0xff]   ;;  %v4832_v2 = vld [vmem:[#allocation4 + $0x280] ss:$16 sps:$4 sm:$0xff]  }
 0x174   : > { %2396 = vmatprep.subr.bf16.mxu0 %v4780_v3  ;;  %2478 = vmatprep.subr.bf16.mxu1 %v4783_v4  ;;  %v4835_v3 = vld [vmem:[#allocation4 + $0x288] ss:$16 sps:$4 sm:$0xff]   ;;  %v4840_v4 = vld [vmem:[#allocation4 + $0x2a4] ss:$16 sps:$4 sm:$0xff]  }
 0x177   : > { %2397 = vmatpush1.bf16.msra.mxu0 %v4778_v6  ;;  %2479 = vmatpush1.bf16.msra.mxu1 %v4781_v7  ;;  %v4843_v6 = vld [vmem:[#allocation4 + $0x2ac] ss:$16 sps:$4 sm:$0xff]   ;;  %v4838_v7 = vld [vmem:[#allocation4 + $0x2a0] ss:$16 sps:$4 sm:$0xff]  }
 0x178   : > { %2398 = vmatprep.subr.bf16.mxu0 %v4786_v10  ;;  %2480 = vmatprep.subr.bf16.mxu1 %v4789_v12  ;;  %v4841_v10 = vld [vmem:[#allocation4 + $0x2a8] ss:$16 sps:$4 sm:$0xff]   ;;  %v4846_v12 = vld [vmem:[#allocation4 + $0x2c4] ss:$16 sps:$4 sm:$0xff]  }
 0x17b   : > { %2399 = vmatpush1.bf16.msra.mxu0 %v4784_v13  ;;  %2481 = vmatpush1.bf16.msra.mxu1 %v4787_v14  ;;  %v4849_v13 = vld [vmem:[#allocation4 + $0x2cc] ss:$16 sps:$4 sm:$0xff]   ;;  %v4844_v14 = vld [vmem:[#allocation4 + $0x2c0] ss:$16 sps:$4 sm:$0xff]  }
 0x17c   : > { %2400 = vmatprep.subr.bf16.mxu0 %v4792_v15  ;;  %2482 = vmatprep.subr.bf16.mxu1 %v4795_v16  ;;  %v4847_v15 = vld [vmem:[#allocation4 + $0x2c8] ss:$16 sps:$4 sm:$0xff]   ;;  %v4852_v16 = vld [vmem:[#allocation4 + $0x2e4] ss:$16 sps:$4 sm:$0xff]  }
 0x17f   : > { %2401 = vmatpush1.bf16.msra.mxu0 %v4790_v17  ;;  %2483 = vmatpush1.bf16.msra.mxu1 %v4793_v18  ;;  %v4855_v17 = vld [vmem:[#allocation4 + $0x2ec] ss:$16 sps:$4 sm:$0xff]   ;;  %v4850_v18 = vld [vmem:[#allocation4 + $0x2e0] ss:$16 sps:$4 sm:$0xff]  }
 0x180   : > { %2402 = vmatprep.subr.bf16.mxu0 %v4798_v19  ;;  %2484 = vmatprep.subr.bf16.mxu1 %v4801_v5  ;;  %v4853_v19 = vld [vmem:[#allocation4 + $0x2e8] ss:$16 sps:$4 sm:$0xff]   ;;  %v4858_v5 = vld [vmem:[#allocation4 + $0x304] ss:$16 sps:$4 sm:$0xff]  }
 0x183   : > { %2403 = vmatpush1.bf16.msra.mxu0 %v4796_v20  ;;  %2485 = vmatpush1.bf16.msra.mxu1 %v4799_v21  ;;  %v4861_v20 = vld [vmem:[#allocation4 + $0x30c] ss:$16 sps:$4 sm:$0xff]   ;;  %v4856_v21 = vld [vmem:[#allocation4 + $0x300] ss:$16 sps:$4 sm:$0xff]  }
 0x184   : > { %2404 = vmatprep.subr.bf16.mxu0 %v4804_v22  ;;  %2486 = vmatprep.subr.bf16.mxu1 %v4807_v23  ;;  %v4859_v22 = vld [vmem:[#allocation4 + $0x308] ss:$16 sps:$4 sm:$0xff]   ;;  %v4864_v23 = vld [vmem:[#allocation4 + $0x324] ss:$16 sps:$4 sm:$0xff]  }
 0x187   : > { %2405 = vmatpush1.bf16.msra.mxu0 %v4802_v24  ;;  %2487 = vmatpush1.bf16.msra.mxu1 %v4805_v25  ;;  %v4867_v24 = vld [vmem:[#allocation4 + $0x32c] ss:$16 sps:$4 sm:$0xff]   ;;  %v4862_v25 = vld [vmem:[#allocation4 + $0x320] ss:$16 sps:$4 sm:$0xff]  }
 0x188   : > { %2415 = vmatprep.subr.bf16.mxu0 %v4810_v26  ;;  %2497 = vmatprep.subr.bf16.mxu1 %v4813_v27  ;;  %v4865_v26 = vld [vmem:[#allocation4 + $0x328] ss:$16 sps:$4 sm:$0xff]   ;;  %v4870_v27 = vld [vmem:[#allocation4 + $0x344] ss:$16 sps:$4 sm:$0xff]  }
 0x21d   : > { %v1487_v32 = vpop.f32.mrb[0].mxu0  ;;  %v5542_v33 = vpop.f32.mrb[0].mxu1 }
 0x21e   : > { %v4424_v34 = vadd.f32 %v1487_v32, %v755_v29  ;;  %v1489_v35 = vpop.f32.mrb[1].mxu0  ;;  %v1571_v36 = vpop.f32.mrb[1].mxu1  ;;  %v4873_v29 = vld [vmem:[#allocation4 + $0x34c] ss:$16 sps:$4 sm:$0xff]   ;;  %v4876_v32 = vld [vmem:[#allocation4 + $0x364] ss:$16 sps:$4 sm:$0xff]  }
 0x21f   : > { %v4425_v37 = vadd.f32 %v1489_v35, %v759_v30  ;;  %v4427_v38 = vadd.f32 %v1571_v36, %v767_v31  ;;  %v1491_v39 = vpop.f32.mrb[2].mxu0  ;;  %v1573_v40 = vpop.f32.mrb[2].mxu1  ;;  %v4868_v30 = vld [vmem:[#allocation4 + $0x340] ss:$16 sps:$4 sm:$0xff]   ;;  %v4871_v31 = vld [vmem:[#allocation4 + $0x348] ss:$16 sps:$4 sm:$0xff]  }
 0x220   : > { %v1576_v41 = vmax.f32 %v4424_v34, 0.0  ;;  %v1492_v42 = vpop.f32.mrb[3].mxu0  ;;  %v1574_v44 = vpop.f32.mrb[3].mxu1  ;;  %v4879_v34 = vld [vmem:[#allocation4 + $0x36c] ss:$16 sps:$4 sm:$0xff]  }
 0x221   : > { %v1577_v45 = vmax.f32 %v4425_v37, 0.0  ;;  %v1579_v46 = vmax.f32 %v4427_v38, 0.0  ;;  %v4874_v35 = vld [vmem:[#allocation4 + $0x360] ss:$16 sps:$4 sm:$0xff]   ;;  %v4877_v36 = vld [vmem:[#allocation4 + $0x368] ss:$16 sps:$4 sm:$0xff]  }
 0x222   : > { %v1580_v50 = vpack.c.bf16 %v1576_v41, %v1576_v41  ;;  %v4882_v37 = vld [vmem:[#allocation4 + $0x384] ss:$16 sps:$4 sm:$0xff]   ;;  %v4885_v38 = vld [vmem:[#allocation4 + $0x38c] ss:$16 sps:$4 sm:$0xff]   ;;  %v4880_v39 = vld [vmem:[#allocation4 + $0x380] ss:$16 sps:$4 sm:$0xff]  }
 0x223   : > { %v1581_v47 = vpack.c.bf16 %v1577_v45, %v1577_v45  ;;  %v1583_v53 = vpack.c.bf16 %v1579_v46, %v1579_v46  ;;  %v4883_v40 = vld [vmem:[#allocation4 + $0x388] ss:$16 sps:$4 sm:$0xff]   ;;  %v4888_v41 = vld [vmem:[#allocation4 + $0x3a4] ss:$16 sps:$4 sm:$0xff]   ;;  %v4891_v42 = vld [vmem:[#allocation4 + $0x3ac] ss:$16 sps:$4 sm:$0xff]   ;;  %v763_v46 = vrot.slane %v5534_v28, %v5489_v8 }
 0x224   : > { %v4886_v44 = vld [vmem:[#allocation4 + $0x3a0] ss:$16 sps:$4 sm:$0xff]   ;;  %v4889_v45 = vld [vmem:[#allocation4 + $0x3a8] ss:$16 sps:$4 sm:$0xff]   ;;  %v4906_v28 = vld [vmem:[#allocation6 + $0x4] ss:$16 sps:$4 sm:$0xff]  }
 0x225   : > { %2406 = vmatprep.mubr.bf16.mxu0 %v1581_v47  ;;  %2488 = vmatprep.mubr.bf16.mxu1 %v1581_v47  ;;  %v4894_v47 = vld [vmem:[#allocation4 + $0x3c4] ss:$16 sps:$4 sm:$0xff]  }
 0x226   : > { %2407 = vmatmul.mubr.bf16.vlgmr.msra.gmra.mrb[4].mxu0 %v1580_v50  ;;  %2489 = vmatmul.mubr.bf16.vlgmr.msra.gmra.mrb[4].mxu1 %v1580_v50  ;;  %v4895_v50 = vld [vmem:[#allocation4 + $0x3c8] ss:$16 sps:$4 sm:$0xff]  }
 0x227   : > { %2416 = vmatpush1.bf16.msra.mxu0 %v4808_v48  ;;  %2498 = vmatpush1.bf16.msra.mxu1 %v4811_v49  ;;  %v4897_v48 = vld [vmem:[#allocation4 + $0x3cc] ss:$16 sps:$4 sm:$0xff]   ;;  %v4892_v49 = vld [vmem:[#allocation4 + $0x3c0] ss:$16 sps:$4 sm:$0xff]  }
 0x228   : > { %2447 = vmatprep.mubr.bf16.mxu0 %v1583_v53  ;;  %2529 = vmatprep.mubr.bf16.mxu1 %v1583_v53  ;;  %v4903_v53 = vld [vmem:[#allocation4 + $0x3ec] ss:$16 sps:$4 sm:$0xff]  }
 0x229   : > { %2417 = vmatprep.subr.bf16.mxu0 %v4816_v51  ;;  %2499 = vmatprep.subr.bf16.mxu1 %v4819_v52  ;;  %v4426_v51 = vadd.f32 %v5542_v33, %v763_v46  ;;  %v4900_v52 = vld [vmem:[#allocation4 + $0x3e4] ss:$16 sps:$4 sm:$0xff]  }
 0x22a   : > { %v4912_v33 = vld [vmem:[#allocation6 + $0x24] ss:$16 sps:$4 sm:$0xff]  }
 0x22b   : > { %2418 = vmatpush1.bf16.msra.mxu0 %v4814_v54  ;;  %2500 = vmatpush1.bf16.msra.mxu1 %v4817_v55  ;;  %v4898_v54 = vld [vmem:[#allocation4 + $0x3e0] ss:$16 sps:$4 sm:$0xff]   ;;  %v4901_v55 = vld [vmem:[#allocation4 + $0x3e8] ss:$16 sps:$4 sm:$0xff]   ;;  %v4978_v46 = vld [vmem:[#allocation6 + $0x184] ss:$16 sps:$4 sm:$0xff]  }
 0x22c   : > { %2419 = vmatprep.subr.bf16.mxu0 %v4822_v56  ;;  %2501 = vmatprep.subr.bf16.mxu1 %v4825_v57  ;;  %v1578_v56 = vmax.f32 %v4426_v51, 0.0  ;;  %v4909_v57 = vld [vmem:[#allocation6 + $0xc] ss:$16 sps:$4 sm:$0xff]  }
 0x22d   : > { %v4987_v51 = vld [vmem:[#allocation6 + $0x1ac] ss:$16 sps:$4 sm:$0xff]  }
 0x22f   : > { %2420 = vmatpush1.bf16.msra.mxu0 %v4820_v58  ;;  %2502 = vmatpush1.bf16.msra.mxu1 %v4823_v59  ;;  %v4904_v58 = vld [vmem:[#allocation6] ss:$16 sps:$4 sm:$0xff]   ;;  %v4907_v59 = vld [vmem:[#allocation6 + $0x8] ss:$16 sps:$4 sm:$0xff]  }
 0x230   : > { %2421 = vmatprep.subr.bf16.mxu0 %v4828_v60  ;;  %2503 = vmatprep.subr.bf16.mxu1 %v4831_v61  ;;  %v1582_v60 = vpack.c.bf16 %v1578_v56, %v1578_v56  ;;  %v4915_v61 = vld [vmem:[#allocation6 + $0x2c] ss:$16 sps:$4 sm:$0xff]   ;;  %v4988_v56 = vld [vmem:[#allocation6 + $0x1c0] ss:$16 sps:$4 sm:$0xff]  }
 0x233   : > { %2422 = vmatpush1.bf16.msra.mxu0 %v4826_v62  ;;  %2504 = vmatpush1.bf16.msra.mxu1 %v4829_v63  ;;  %v4910_v62 = vld [vmem:[#allocation6 + $0x20] ss:$16 sps:$4 sm:$0xff]   ;;  %v4913_v63 = vld [vmem:[#allocation6 + $0x28] ss:$16 sps:$4 sm:$0xff]  }
 0x234   : > { %2423 = vmatprep.subr.bf16.mxu0 %v4834_v0  ;;  %2505 = vmatprep.subr.bf16.mxu1 %v4837_v1  ;;  %v4918_v0 = vld [vmem:[#allocation6 + $0x44] ss:$16 sps:$4 sm:$0xff]   ;;  %v4921_v1 = vld [vmem:[#allocation6 + $0x4c] ss:$16 sps:$4 sm:$0xff]  }
 0x237   : > { %2424 = vmatpush1.bf16.msra.mxu0 %v4832_v2  ;;  %2506 = vmatpush1.bf16.msra.mxu1 %v4835_v3  ;;  %v4916_v2 = vld [vmem:[#allocation6 + $0x40] ss:$16 sps:$4 sm:$0xff]   ;;  %v4919_v3 = vld [vmem:[#allocation6 + $0x48] ss:$16 sps:$4 sm:$0xff]  }
 0x238   : > { %2425 = vmatprep.subr.bf16.mxu0 %v4840_v4  ;;  %2507 = vmatprep.subr.bf16.mxu1 %v4843_v6  ;;  %v4924_v4 = vld [vmem:[#allocation6 + $0x64] ss:$16 sps:$4 sm:$0xff]   ;;  %v4927_v6 = vld [vmem:[#allocation6 + $0x6c] ss:$16 sps:$4 sm:$0xff]  }
 0x23b   : > { %2426 = vmatpush1.bf16.msra.mxu0 %v4838_v7  ;;  %2508 = vmatpush1.bf16.msra.mxu1 %v4841_v10  ;;  %v4922_v7 = vld [vmem:[#allocation6 + $0x60] ss:$16 sps:$4 sm:$0xff]   ;;  %v4925_v10 = vld [vmem:[#allocation6 + $0x68] ss:$16 sps:$4 sm:$0xff]  }
 0x23c   : > { %2427 = vmatprep.subr.bf16.mxu0 %v4846_v12  ;;  %2509 = vmatprep.subr.bf16.mxu1 %v4849_v13  ;;  %v4930_v12 = vld [vmem:[#allocation6 + $0x84] ss:$16 sps:$4 sm:$0xff]   ;;  %v4933_v13 = vld [vmem:[#allocation6 + $0x8c] ss:$16 sps:$4 sm:$0xff]  }
 0x23f   : > { %2428 = vmatpush1.bf16.msra.mxu0 %v4844_v14  ;;  %2510 = vmatpush1.bf16.msra.mxu1 %v4847_v15  ;;  %v4928_v14 = vld [vmem:[#allocation6 + $0x80] ss:$16 sps:$4 sm:$0xff]   ;;  %v4931_v15 = vld [vmem:[#allocation6 + $0x88] ss:$16 sps:$4 sm:$0xff]  }
 0x240   : > { %2429 = vmatprep.subr.bf16.mxu0 %v4852_v16  ;;  %2511 = vmatprep.subr.bf16.mxu1 %v4855_v17  ;;  %v4936_v16 = vld [vmem:[#allocation6 + $0xa4] ss:$16 sps:$4 sm:$0xff]   ;;  %v4939_v17 = vld [vmem:[#allocation6 + $0xac] ss:$16 sps:$4 sm:$0xff]  }
 0x243   : > { %2430 = vmatpush1.bf16.msra.mxu0 %v4850_v18  ;;  %2512 = vmatpush1.bf16.msra.mxu1 %v4853_v19  ;;  %v4934_v18 = vld [vmem:[#allocation6 + $0xa0] ss:$16 sps:$4 sm:$0xff]   ;;  %v4937_v19 = vld [vmem:[#allocation6 + $0xa8] ss:$16 sps:$4 sm:$0xff]  }
 0x244   : > { %2431 = vmatprep.subr.bf16.mxu0 %v4858_v5  ;;  %2513 = vmatprep.subr.bf16.mxu1 %v4861_v20  ;;  %v4942_v5 = vld [vmem:[#allocation6 + $0xc4] ss:$16 sps:$4 sm:$0xff]   ;;  %v4945_v20 = vld [vmem:[#allocation6 + $0xcc] ss:$16 sps:$4 sm:$0xff]  }
 0x247   : > { %2432 = vmatpush1.bf16.msra.mxu0 %v4856_v21  ;;  %2514 = vmatpush1.bf16.msra.mxu1 %v4859_v22  ;;  %v4940_v21 = vld [vmem:[#allocation6 + $0xc0] ss:$16 sps:$4 sm:$0xff]   ;;  %v4943_v22 = vld [vmem:[#allocation6 + $0xc8] ss:$16 sps:$4 sm:$0xff]  }
 0x248   : > { %2433 = vmatprep.subr.bf16.mxu0 %v4864_v23  ;;  %2515 = vmatprep.subr.bf16.mxu1 %v4867_v24  ;;  %v4948_v23 = vld [vmem:[#allocation6 + $0xe4] ss:$16 sps:$4 sm:$0xff]   ;;  %v4951_v24 = vld [vmem:[#allocation6 + $0xec] ss:$16 sps:$4 sm:$0xff]  }
 0x24b   : > { %2434 = vmatpush1.bf16.msra.mxu0 %v4862_v25  ;;  %2516 = vmatpush1.bf16.msra.mxu1 %v4865_v26  ;;  %v4946_v25 = vld [vmem:[#allocation6 + $0xe0] ss:$16 sps:$4 sm:$0xff]   ;;  %v4949_v26 = vld [vmem:[#allocation6 + $0xe8] ss:$16 sps:$4 sm:$0xff]  }
 0x24c   : > { %2435 = vmatprep.subr.bf16.mxu0 %v4870_v27  ;;  %2517 = vmatprep.subr.bf16.mxu1 %v4873_v29  ;;  %v4954_v27 = vld [vmem:[#allocation6 + $0x104] ss:$16 sps:$4 sm:$0xff]   ;;  %v4957_v29 = vld [vmem:[#allocation6 + $0x10c] ss:$16 sps:$4 sm:$0xff]  }
 0x24f   : > { %2436 = vmatpush1.bf16.msra.mxu0 %v4868_v30  ;;  %2518 = vmatpush1.bf16.msra.mxu1 %v4871_v31  ;;  %v4952_v30 = vld [vmem:[#allocation6 + $0x100] ss:$16 sps:$4 sm:$0xff]   ;;  %v4955_v31 = vld [vmem:[#allocation6 + $0x108] ss:$16 sps:$4 sm:$0xff]  }
 0x250   : > { %2437 = vmatprep.subr.bf16.mxu0 %v4876_v32  ;;  %2519 = vmatprep.subr.bf16.mxu1 %v4879_v34  ;;  %v4960_v32 = vld [vmem:[#allocation6 + $0x124] ss:$16 sps:$4 sm:$0xff]   ;;  %v4963_v34 = vld [vmem:[#allocation6 + $0x12c] ss:$16 sps:$4 sm:$0xff]  }
 0x253   : > { %2438 = vmatpush1.bf16.msra.mxu0 %v4874_v35  ;;  %2520 = vmatpush1.bf16.msra.mxu1 %v4877_v36  ;;  %v4958_v35 = vld [vmem:[#allocation6 + $0x120] ss:$16 sps:$4 sm:$0xff]   ;;  %v4961_v36 = vld [vmem:[#allocation6 + $0x128] ss:$16 sps:$4 sm:$0xff]  }
 0x254   : > { %2439 = vmatprep.subr.bf16.mxu0 %v4882_v37  ;;  %2521 = vmatprep.subr.bf16.mxu1 %v4885_v38  ;;  %v4966_v37 = vld [vmem:[#allocation6 + $0x144] ss:$16 sps:$4 sm:$0xff]   ;;  %v4969_v38 = vld [vmem:[#allocation6 + $0x14c] ss:$16 sps:$4 sm:$0xff]  }
 0x257   : > { %2440 = vmatpush1.bf16.msra.mxu0 %v4880_v39  ;;  %2522 = vmatpush1.bf16.msra.mxu1 %v4883_v40  ;;  %v4964_v39 = vld [vmem:[#allocation6 + $0x140] ss:$16 sps:$4 sm:$0xff]   ;;  %v4967_v40 = vld [vmem:[#allocation6 + $0x148] ss:$16 sps:$4 sm:$0xff]  }
 0x258   : > { %2441 = vmatprep.subr.bf16.mxu0 %v4888_v41  ;;  %2523 = vmatprep.subr.bf16.mxu1 %v4891_v42  ;;  %v4972_v41 = vld [vmem:[#allocation6 + $0x164] ss:$16 sps:$4 sm:$0xff]   ;;  %v4975_v42 = vld [vmem:[#allocation6 + $0x16c] ss:$16 sps:$4 sm:$0xff]  }
 0x25b   : > { %2442 = vmatpush1.bf16.msra.mxu0 %v4886_v44  ;;  %2524 = vmatpush1.bf16.msra.mxu1 %v4889_v45  ;;  %v4970_v44 = vld [vmem:[#allocation6 + $0x160] ss:$16 sps:$4 sm:$0xff]   ;;  %v4973_v45 = vld [vmem:[#allocation6 + $0x168] ss:$16 sps:$4 sm:$0xff]  }
 0x25c   : > { %2443 = vmatprep.subr.bf16.mxu0 %v4894_v47  ;;  %2525 = vmatprep.subr.bf16.mxu1 %v4897_v48  ;;  %v4981_v47 = vld [vmem:[#allocation6 + $0x18c] ss:$16 sps:$4 sm:$0xff]   ;;  %v4976_v48 = vld [vmem:[#allocation6 + $0x180] ss:$16 sps:$4 sm:$0xff]  }
 0x25f   : > { %2444 = vmatpush1.bf16.msra.mxu0 %v4892_v49  ;;  %2526 = vmatpush1.bf16.msra.mxu1 %v4895_v50  ;;  %v4979_v49 = vld [vmem:[#allocation6 + $0x188] ss:$16 sps:$4 sm:$0xff]   ;;  %v4984_v50 = vld [vmem:[#allocation6 + $0x1a4] ss:$16 sps:$4 sm:$0xff]  }
 0x260   : > { %2445 = vmatprep.subr.bf16.mxu0 %v4900_v52  ;;  %2527 = vmatprep.subr.bf16.mxu1 %v4903_v53  ;;  %v4982_v52 = vld [vmem:[#allocation6 + $0x1a0] ss:$16 sps:$4 sm:$0xff]   ;;  %v4985_v53 = vld [vmem:[#allocation6 + $0x1a8] ss:$16 sps:$4 sm:$0xff]  }
 0x263   : > { %2446 = vmatpush1.bf16.msra.mxu0 %v4898_v54  ;;  %2528 = vmatpush1.bf16.msra.mxu1 %v4901_v55  ;;  %v4990_v54 = vld [vmem:[#allocation6 + $0x1c4] ss:$16 sps:$4 sm:$0xff]   ;;  %v4993_v55 = vld [vmem:[#allocation6 + $0x1cc] ss:$16 sps:$4 sm:$0xff]  }
 0x264   : > { %3336 = vmatprep.subr.bf16.mxu0 %v4906_v28  ;;  %3418 = vmatprep.subr.bf16.mxu1 %v4909_v57  ;;  %v4991_v28 = vld [vmem:[#allocation6 + $0x1c8] ss:$16 sps:$4 sm:$0xff]   ;;  %v4996_v57 = vld [vmem:[#allocation6 + $0x1e4] ss:$16 sps:$4 sm:$0xff]  }
 0x266   : > { %2448 = vmatmul.mubr.bf16.vlgmr.msra.gmra.mrb[4].mxu0 %v1582_v60  ;;  %2530 = vmatmul.mubr.bf16.vlgmr.msra.gmra.mrb[4].mxu1 %v1582_v60  ;;  %v4997_v60 = vld [vmem:[#allocation6 + $0x1e8] ss:$16 sps:$4 sm:$0xff]  }
 0x267   : > { %3337 = vmatpush1.bf16.msra.mxu0 %v4904_v58  ;;  %3419 = vmatpush1.bf16.msra.mxu1 %v4907_v59  ;;  %v4999_v58 = vld [vmem:[#allocation6 + $0x1ec] ss:$16 sps:$4 sm:$0xff]   ;;  %v4994_v59 = vld [vmem:[#allocation6 + $0x1e0] ss:$16 sps:$4 sm:$0xff]  }
 0x268   : > { %3338 = vmatprep.subr.bf16.mxu0 %v4912_v33  ;;  %3420 = vmatprep.subr.bf16.mxu1 %v4915_v61  ;;  %v5002_v33 = vld [vmem:[#allocation6 + $0x204] ss:$16 sps:$4 sm:$0xff]   ;;  %v5005_v61 = vld [vmem:[#allocation6 + $0x20c] ss:$16 sps:$4 sm:$0xff]  }
 0x26b   : > { %3339 = vmatpush1.bf16.msra.mxu0 %v4910_v62  ;;  %3421 = vmatpush1.bf16.msra.mxu1 %v4913_v63  ;;  %v5550_v62 = vld [vmem:[%s5587_s6] sm:$0xf] }
 0x26c   : > { %3340 = vmatprep.subr.bf16.mxu0 %v4918_v0  ;;  %3422 = vmatprep.subr.bf16.mxu1 %v4921_v1  ;;  %v1717_v63 = vrot.slane %v5550_v62, %v5491_v9  ;;  %v1721_v0 = vrot.slane %v5550_v62, %v5493_v11  ;;  %v1729_v1 = vrot.slane %v5550_v62, %v5519_v43 }
 0x26f   : > { %3341 = vmatpush1.bf16.msra.mxu0 %v4916_v2  ;;  %3423 = vmatpush1.bf16.msra.mxu1 %v4919_v3 }
 0x270   : > { %3342 = vmatprep.subr.bf16.mxu0 %v4924_v4  ;;  %3424 = vmatprep.subr.bf16.mxu1 %v4927_v6 }
 0x273   : > { %3343 = vmatpush1.bf16.msra.mxu0 %v4922_v7  ;;  %3425 = vmatpush1.bf16.msra.mxu1 %v4925_v10 }
 0x274   : > { %3344 = vmatprep.subr.bf16.mxu0 %v4930_v12  ;;  %3426 = vmatprep.subr.bf16.mxu1 %v4933_v13 }
 0x277   : > { %3345 = vmatpush1.bf16.msra.mxu0 %v4928_v14  ;;  %3427 = vmatpush1.bf16.msra.mxu1 %v4931_v15 }
 0x278   : > { %3346 = vmatprep.subr.bf16.mxu0 %v4936_v16  ;;  %3428 = vmatprep.subr.bf16.mxu1 %v4939_v17 }
 0x27b   : > { %3347 = vmatpush1.bf16.msra.mxu0 %v4934_v18  ;;  %3429 = vmatpush1.bf16.msra.mxu1 %v4937_v19 }
 0x27c   : > { %3348 = vmatprep.subr.bf16.mxu0 %v4942_v5  ;;  %3430 = vmatprep.subr.bf16.mxu1 %v4945_v20  ;;  %v5000_v20 = vld [vmem:[#allocation6 + $0x200] ss:$16 sps:$4 sm:$0xff]  }
 0x27f   : > { %3349 = vmatpush1.bf16.msra.mxu0 %v4940_v21  ;;  %3431 = vmatpush1.bf16.msra.mxu1 %v4943_v22  ;;  %v5003_v21 = vld [vmem:[#allocation6 + $0x208] ss:$16 sps:$4 sm:$0xff]  }
 0x280   : > { %3350 = vmatprep.subr.bf16.mxu0 %v4948_v23  ;;  %3432 = vmatprep.subr.bf16.mxu1 %v4951_v24  ;;  %v5008_v23 = vld [vmem:[#allocation6 + $0x224] ss:$16 sps:$4 sm:$0xff]   ;;  %v5011_v24 = vld [vmem:[#allocation6 + $0x22c] ss:$16 sps:$4 sm:$0xff]  }
 0x283   : > { %3351 = vmatpush1.bf16.msra.mxu0 %v4946_v25  ;;  %3433 = vmatpush1.bf16.msra.mxu1 %v4949_v26  ;;  %v5006_v26 = vld [vmem:[#allocation6 + $0x220] ss:$16 sps:$4 sm:$0xff]  }
 0x284   : > { %3352 = vmatprep.subr.bf16.mxu0 %v4954_v27  ;;  %3434 = vmatprep.subr.bf16.mxu1 %v4957_v29  ;;  %v5009_v27 = vld [vmem:[#allocation6 + $0x228] ss:$16 sps:$4 sm:$0xff]   ;;  %v5014_v29 = vld [vmem:[#allocation6 + $0x244] ss:$16 sps:$4 sm:$0xff]  }
 0x287   : > { %3353 = vmatpush1.bf16.msra.mxu0 %v4952_v30  ;;  %3435 = vmatpush1.bf16.msra.mxu1 %v4955_v31  ;;  %v5017_v30 = vld [vmem:[#allocation6 + $0x24c] ss:$16 sps:$4 sm:$0xff]   ;;  %v5012_v31 = vld [vmem:[#allocation6 + $0x240] ss:$16 sps:$4 sm:$0xff]  }
 0x288   : > { %3354 = vmatprep.subr.bf16.mxu0 %v4960_v32  ;;  %3436 = vmatprep.subr.bf16.mxu1 %v4963_v34  ;;  %v5015_v32 = vld [vmem:[#allocation6 + $0x248] ss:$16 sps:$4 sm:$0xff]   ;;  %v5020_v34 = vld [vmem:[#allocation6 + $0x264] ss:$16 sps:$4 sm:$0xff]  }
 0x28b   : > { %3355 = vmatpush1.bf16.msra.mxu0 %v4958_v35  ;;  %3437 = vmatpush1.bf16.msra.mxu1 %v4961_v36  ;;  %v5023_v35 = vld [vmem:[#allocation6 + $0x26c] ss:$16 sps:$4 sm:$0xff]   ;;  %v5018_v36 = vld [vmem:[#allocation6 + $0x260] ss:$16 sps:$4 sm:$0xff]  }
 0x28c   : > { %3356 = vmatprep.subr.bf16.mxu0 %v4966_v37  ;;  %3438 = vmatprep.subr.bf16.mxu1 %v4969_v38  ;;  %v5021_v37 = vld [vmem:[#allocation6 + $0x268] ss:$16 sps:$4 sm:$0xff]   ;;  %v5026_v38 = vld [vmem:[#allocation6 + $0x284] ss:$16 sps:$4 sm:$0xff]  }
 0x28f   : > { %3357 = vmatpush1.bf16.msra.mxu0 %v4964_v39  ;;  %3439 = vmatpush1.bf16.msra.mxu1 %v4967_v40  ;;  %v5029_v39 = vld [vmem:[#allocation6 + $0x28c] ss:$16 sps:$4 sm:$0xff]   ;;  %v5024_v40 = vld [vmem:[#allocation6 + $0x280] ss:$16 sps:$4 sm:$0xff]  }
 0x290   : > { %3358 = vmatprep.subr.bf16.mxu0 %v4972_v41  ;;  %3440 = vmatprep.subr.bf16.mxu1 %v4975_v42  ;;  %v5027_v41 = vld [vmem:[#allocation6 + $0x288] ss:$16 sps:$4 sm:$0xff]   ;;  %v5032_v42 = vld [vmem:[#allocation6 + $0x2a4] ss:$16 sps:$4 sm:$0xff]  }
 0x293   : > { %3359 = vmatpush1.bf16.msra.mxu0 %v4970_v44  ;;  %3441 = vmatpush1.bf16.msra.mxu1 %v4973_v45  ;;  %v5035_v44 = vld [vmem:[#allocation6 + $0x2ac] ss:$16 sps:$4 sm:$0xff]   ;;  %v5030_v45 = vld [vmem:[#allocation6 + $0x2a0] ss:$16 sps:$4 sm:$0xff]  }
 0x294   : > { %3360 = vmatprep.subr.bf16.mxu0 %v4978_v46  ;;  %3442 = vmatprep.subr.bf16.mxu1 %v4981_v47  ;;  %v5033_v46 = vld [vmem:[#allocation6 + $0x2a8] ss:$16 sps:$4 sm:$0xff]   ;;  %v5038_v47 = vld [vmem:[#allocation6 + $0x2c4] ss:$16 sps:$4 sm:$0xff]  }
 0x297   : > { %3361 = vmatpush1.bf16.msra.mxu0 %v4976_v48  ;;  %3443 = vmatpush1.bf16.msra.mxu1 %v4979_v49  ;;  %v5041_v48 = vld [vmem:[#allocation6 + $0x2cc] ss:$16 sps:$4 sm:$0xff]   ;;  %v5036_v49 = vld [vmem:[#allocation6 + $0x2c0] ss:$16 sps:$4 sm:$0xff]  }
 0x298   : > { %3362 = vmatprep.subr.bf16.mxu0 %v4984_v50  ;;  %3444 = vmatprep.subr.bf16.mxu1 %v4987_v51  ;;  %v5039_v50 = vld [vmem:[#allocation6 + $0x2c8] ss:$16 sps:$4 sm:$0xff]   ;;  %v5044_v51 = vld [vmem:[#allocation6 + $0x2e4] ss:$16 sps:$4 sm:$0xff]  }
 0x29b   : > { %3363 = vmatpush1.bf16.msra.mxu0 %v4982_v52  ;;  %3445 = vmatpush1.bf16.msra.mxu1 %v4985_v53  ;;  %v5047_v52 = vld [vmem:[#allocation6 + $0x2ec] ss:$16 sps:$4 sm:$0xff]   ;;  %v5042_v53 = vld [vmem:[#allocation6 + $0x2e0] ss:$16 sps:$4 sm:$0xff]  }
 0x29c   : > { %3364 = vmatprep.subr.bf16.mxu0 %v4990_v54  ;;  %3446 = vmatprep.subr.bf16.mxu1 %v4993_v55  ;;  %v5045_v54 = vld [vmem:[#allocation6 + $0x2e8] ss:$16 sps:$4 sm:$0xff]   ;;  %v5050_v55 = vld [vmem:[#allocation6 + $0x304] ss:$16 sps:$4 sm:$0xff]  }
 0x29f   : > { %3365 = vmatpush1.bf16.msra.mxu0 %v4988_v56  ;;  %3447 = vmatpush1.bf16.msra.mxu1 %v4991_v28  ;;  %v5053_v56 = vld [vmem:[#allocation6 + $0x30c] ss:$16 sps:$4 sm:$0xff]   ;;  %v5048_v28 = vld [vmem:[#allocation6 + $0x300] ss:$16 sps:$4 sm:$0xff]  }
 0x2a0   : > { %3366 = vmatprep.subr.bf16.mxu0 %v4996_v57  ;;  %3448 = vmatprep.subr.bf16.mxu1 %v4999_v58  ;;  %v5051_v57 = vld [vmem:[#allocation6 + $0x308] ss:$16 sps:$4 sm:$0xff]   ;;  %v5056_v58 = vld [vmem:[#allocation6 + $0x324] ss:$16 sps:$4 sm:$0xff]  }
 0x2a3   : > { %3367 = vmatpush1.bf16.msra.mxu0 %v4994_v59  ;;  %3449 = vmatpush1.bf16.msra.mxu1 %v4997_v60  ;;  %v5059_v59 = vld [vmem:[#allocation6 + $0x32c] ss:$16 sps:$4 sm:$0xff]   ;;  %v5054_v60 = vld [vmem:[#allocation6 + $0x320] ss:$16 sps:$4 sm:$0xff]  }
 0x2a4   : > { %3377 = vmatprep.subr.bf16.mxu0 %v5002_v33  ;;  %3459 = vmatprep.subr.bf16.mxu1 %v5005_v61  ;;  %v5057_v33 = vld [vmem:[#allocation6 + $0x328] ss:$16 sps:$4 sm:$0xff]   ;;  %v5062_v61 = vld [vmem:[#allocation6 + $0x344] ss:$16 sps:$4 sm:$0xff]  }
 0x339   : > { %v2449_v2 = vpop.f32.mrb[4].mxu0  ;;  %v5558_v3 = vpop.f32.mrb[4].mxu1 }
 0x33a   : > { %v4428_v4 = vadd.f32 %v2449_v2, %v1717_v63  ;;  %v2451_v6 = vpop.f32.mrb[5].mxu0  ;;  %v2533_v7 = vpop.f32.mrb[5].mxu1  ;;  %v5065_v63 = vld [vmem:[#allocation6 + $0x34c] ss:$16 sps:$4 sm:$0xff]   ;;  %v5068_v2 = vld [vmem:[#allocation6 + $0x364] ss:$16 sps:$4 sm:$0xff]  }
 0x33b   : > { %v4429_v10 = vadd.f32 %v2451_v6, %v1721_v0  ;;  %v4431_v12 = vadd.f32 %v2533_v7, %v1729_v1  ;;  %v2453_v13 = vpop.f32.mrb[6].mxu0  ;;  %v2535_v14 = vpop.f32.mrb[6].mxu1  ;;  %v5060_v0 = vld [vmem:[#allocation6 + $0x340] ss:$16 sps:$4 sm:$0xff]   ;;  %v5063_v1 = vld [vmem:[#allocation6 + $0x348] ss:$16 sps:$4 sm:$0xff]  }
 0x33c   : > { %v2538_v15 = vmax.f32 %v4428_v4, 0.0  ;;  %v2454_v16 = vpop.f32.mrb[7].mxu0  ;;  %v2536_v17 = vpop.f32.mrb[7].mxu1  ;;  %v5071_v4 = vld [vmem:[#allocation6 + $0x36c] ss:$16 sps:$4 sm:$0xff]  }
 0x33d   : > { %v2539_v18 = vmax.f32 %v4429_v10, 0.0  ;;  %v2541_v19 = vmax.f32 %v4431_v12, 0.0  ;;  %v5066_v6 = vld [vmem:[#allocation6 + $0x360] ss:$16 sps:$4 sm:$0xff]   ;;  %v5069_v7 = vld [vmem:[#allocation6 + $0x368] ss:$16 sps:$4 sm:$0xff]  }
 0x33e   : > { %v2542_v22 = vpack.c.bf16 %v2538_v15, %v2538_v15  ;;  %v5074_v10 = vld [vmem:[#allocation6 + $0x384] ss:$16 sps:$4 sm:$0xff]   ;;  %v5077_v12 = vld [vmem:[#allocation6 + $0x38c] ss:$16 sps:$4 sm:$0xff]   ;;  %v5072_v13 = vld [vmem:[#allocation6 + $0x380] ss:$16 sps:$4 sm:$0xff]  }
 0x33f   : > { %v2543_v5 = vpack.c.bf16 %v2539_v18, %v2539_v18  ;;  %v2545_v25 = vpack.c.bf16 %v2541_v19, %v2541_v19  ;;  %v5075_v14 = vld [vmem:[#allocation6 + $0x388] ss:$16 sps:$4 sm:$0xff]   ;;  %v5080_v15 = vld [vmem:[#allocation6 + $0x3a4] ss:$16 sps:$4 sm:$0xff]   ;;  %v5083_v16 = vld [vmem:[#allocation6 + $0x3ac] ss:$16 sps:$4 sm:$0xff]   ;;  %v1725_v19 = vrot.slane %v5550_v62, %v5489_v8 }
 0x340   : > { %v5078_v17 = vld [vmem:[#allocation6 + $0x3a0] ss:$16 sps:$4 sm:$0xff]   ;;  %v5081_v18 = vld [vmem:[#allocation6 + $0x3a8] ss:$16 sps:$4 sm:$0xff]  }
 0x341   : > { %3368 = vmatprep.mubr.bf16.mxu0 %v2543_v5  ;;  %3450 = vmatprep.mubr.bf16.mxu1 %v2543_v5  ;;  %v5086_v5 = vld [vmem:[#allocation6 + $0x3c4] ss:$16 sps:$4 sm:$0xff]  }
 0x342   : > { %3369 = vmatmul.mubr.bf16.vlgmr.msra.gmra.mrb[8].mxu0 %v2542_v22  ;;  %3451 = vmatmul.mubr.bf16.vlgmr.msra.gmra.mrb[8].mxu1 %v2542_v22  ;;  %v5087_v22 = vld [vmem:[#allocation6 + $0x3c8] ss:$16 sps:$4 sm:$0xff]   ;;  %v5096_v62 = vld [vmem:[#allocation7 + $0x40] sm:$0xff]  }
 0x343   : > { %3378 = vmatpush1.bf16.msra.mxu0 %v5000_v20  ;;  %3460 = vmatpush1.bf16.msra.mxu1 %v5003_v21  ;;  %v5089_v20 = vld [vmem:[#allocation6 + $0x3cc] ss:$16 sps:$4 sm:$0xff]   ;;  %v5084_v21 = vld [vmem:[#allocation6 + $0x3c0] ss:$16 sps:$4 sm:$0xff]  }
 0x344   : > { %3409 = vmatprep.mubr.bf16.mxu0 %v2545_v25  ;;  %3491 = vmatprep.mubr.bf16.mxu1 %v2545_v25  ;;  %v5095_v25 = vld [vmem:[#allocation6 + $0x3ec] ss:$16 sps:$4 sm:$0xff]  }
 0x345   : > { %3379 = vmatprep.subr.bf16.mxu0 %v5008_v23  ;;  %3461 = vmatprep.subr.bf16.mxu1 %v5011_v24  ;;  %v4430_v23 = vadd.f32 %v5558_v3, %v1725_v19  ;;  %v5092_v24 = vld [vmem:[#allocation6 + $0x3e4] ss:$16 sps:$4 sm:$0xff]   ;;  %v5100_v3 = vld [vmem:[#allocation7 + $0x48] sm:$0xff]  }
 0x347   : > { %3380 = vmatpush1.bf16.msra.mxu0 %v5006_v26  ;;  %3462 = vmatpush1.bf16.msra.mxu1 %v5009_v27  ;;  %v5090_v26 = vld [vmem:[#allocation6 + $0x3e0] ss:$16 sps:$4 sm:$0xff]   ;;  %v5093_v27 = vld [vmem:[#allocation6 + $0x3e8] ss:$16 sps:$4 sm:$0xff]  }
 0x348   : > { %3381 = vmatprep.subr.bf16.mxu0 %v5014_v29  ;;  %3463 = vmatprep.subr.bf16.mxu1 %v5017_v30  ;;  %v2540_v29 = vmax.f32 %v4430_v23, 0.0  ;;  %v5097_v30 = vld [vmem:[#allocation7 + $0xc0] sm:$0xff]  }
 0x34b   : > { %3382 = vmatpush1.bf16.msra.mxu0 %v5012_v31  ;;  %3464 = vmatpush1.bf16.msra.mxu1 %v5015_v32  ;;  %v5098_v31 = vld [vmem:[#allocation7] sm:$0xff]  }
 0x34c   : > { %3383 = vmatprep.subr.bf16.mxu0 %v5020_v34  ;;  %3465 = vmatprep.subr.bf16.mxu1 %v5023_v35  ;;  %v5099_v32 = vld [vmem:[#allocation7 + $0x80] sm:$0xff]   ;;  %v2544_v34 = vpack.c.bf16 %v2540_v29, %v2540_v29  ;;  %v5101_v35 = vld [vmem:[#allocation7 + $0xc8] sm:$0xff]  }
 0x34f   : > { %3384 = vmatpush1.bf16.msra.mxu0 %v5018_v36  ;;  %3466 = vmatpush1.bf16.msra.mxu1 %v5021_v37  ;;  %v5102_v36 = vld [vmem:[#allocation7 + $0x8] sm:$0xff]  }
 0x350   : > { %3385 = vmatprep.subr.bf16.mxu0 %v5026_v38  ;;  %3467 = vmatprep.subr.bf16.mxu1 %v5029_v39  ;;  %v5103_v37 = vld [vmem:[#allocation7 + $0x88] sm:$0xff]   ;;  %v5104_v38 = vld [vmem:[#allocation7 + $0x50] sm:$0xff]  }
 0x351   : > { %v5105_v39 = vld [vmem:[#allocation7 + $0xd0] sm:$0xff]  }
 0x353   : > { %3386 = vmatpush1.bf16.msra.mxu0 %v5024_v40  ;;  %3468 = vmatpush1.bf16.msra.mxu1 %v5027_v41  ;;  %v5106_v40 = vld [vmem:[#allocation7 + $0x10] sm:$0xff]  }
 0x354   : > { %3387 = vmatprep.subr.bf16.mxu0 %v5032_v42  ;;  %3469 = vmatprep.subr.bf16.mxu1 %v5035_v44  ;;  %v5107_v41 = vld [vmem:[#allocation7 + $0x90] sm:$0xff]   ;;  %v5108_v42 = vld [vmem:[#allocation7 + $0x58] sm:$0xff]  }
 0x355   : > { %v5109_v44 = vld [vmem:[#allocation7 + $0xd8] sm:$0xff]  }
 0x357   : > { %3388 = vmatpush1.bf16.msra.mxu0 %v5030_v45  ;;  %3470 = vmatpush1.bf16.msra.mxu1 %v5033_v46  ;;  %v5110_v45 = vld [vmem:[#allocation7 + $0x18] sm:$0xff]  }
 0x358   : > { %3389 = vmatprep.subr.bf16.mxu0 %v5038_v47  ;;  %3471 = vmatprep.subr.bf16.mxu1 %v5041_v48  ;;  %v5111_v46 = vld [vmem:[#allocation7 + $0x98] sm:$0xff]   ;;  %v5112_v47 = vld [vmem:[#allocation7 + $0x60] sm:$0xff]  }
 0x359   : > { %v5113_v48 = vld [vmem:[#allocation7 + $0xe0] sm:$0xff]  }
 0x35b   : > { %3390 = vmatpush1.bf16.msra.mxu0 %v5036_v49  ;;  %3472 = vmatpush1.bf16.msra.mxu1 %v5039_v50  ;;  %v5114_v49 = vld [vmem:[#allocation7 + $0x20] sm:$0xff]  }
 0x35c   : > { %3391 = vmatprep.subr.bf16.mxu0 %v5044_v51  ;;  %3473 = vmatprep.subr.bf16.mxu1 %v5047_v52  ;;  %v5115_v50 = vld [vmem:[#allocation7 + $0xa0] sm:$0xff]   ;;  %v5116_v51 = vld [vmem:[#allocation7 + $0x68] sm:$0xff]  }
 0x35d   : > { %v5117_v52 = vld [vmem:[#allocation7 + $0xe8] sm:$0xff]  }
 0x35f   : > { %3392 = vmatpush1.bf16.msra.mxu0 %v5042_v53  ;;  %3474 = vmatpush1.bf16.msra.mxu1 %v5045_v54  ;;  %v5118_v53 = vld [vmem:[#allocation7 + $0x28] sm:$0xff]  }
 0x360   : > { %3393 = vmatprep.subr.bf16.mxu0 %v5050_v55  ;;  %3475 = vmatprep.subr.bf16.mxu1 %v5053_v56  ;;  %v5119_v54 = vld [vmem:[#allocation7 + $0xa8] sm:$0xff]   ;;  %v5120_v55 = vld [vmem:[#allocation7 + $0x70] sm:$0xff]  }
 0x361   : > { %v5121_v56 = vld [vmem:[#allocation7 + $0xf0] sm:$0xff]  }
 0x363   : > { %3394 = vmatpush1.bf16.msra.mxu0 %v5048_v28  ;;  %3476 = vmatpush1.bf16.msra.mxu1 %v5051_v57  ;;  %v5122_v28 = vld [vmem:[#allocation7 + $0x30] sm:$0xff]  }
 0x364   : > { %3395 = vmatprep.subr.bf16.mxu0 %v5056_v58  ;;  %3477 = vmatprep.subr.bf16.mxu1 %v5059_v59  ;;  %v5123_v57 = vld [vmem:[#allocation7 + $0xb0] sm:$0xff]   ;;  %v5124_v58 = vld [vmem:[#allocation7 + $0x78] sm:$0xff]  }
 0x365   : > { %v5125_v59 = vld [vmem:[#allocation7 + $0xf8] sm:$0xff]  }
 0x367   : > { %3396 = vmatpush1.bf16.msra.mxu0 %v5054_v60  ;;  %3478 = vmatpush1.bf16.msra.mxu1 %v5057_v33  ;;  %v5126_v60 = vld [vmem:[#allocation7 + $0x38] sm:$0xff]  }
 0x368   : > { %3397 = vmatprep.subr.bf16.mxu0 %v5062_v61  ;;  %3479 = vmatprep.subr.bf16.mxu1 %v5065_v63  ;;  %v5127_v33 = vld [vmem:[#allocation7 + $0xb8] sm:$0xff]   ;;  %v2674_v61 = vld [vmem:[%s5589_s8] sm:$0xf] }
 0x369   : > { %v2679_v63 = vrot.slane %v2674_v61, %v5491_v9 }
 0x36b   : > { %3398 = vmatpush1.bf16.msra.mxu0 %v5060_v0  ;;  %3480 = vmatpush1.bf16.msra.mxu1 %v5063_v1  ;;  %v2687_v0 = vrot.slane %v2674_v61, %v5489_v8  ;;  %v2683_v1 = vrot.slane %v2674_v61, %v5493_v11 }
 0x36c   : > { %3399 = vmatprep.subr.bf16.mxu0 %v5068_v2  ;;  %3481 = vmatprep.subr.bf16.mxu1 %v5071_v4  ;;  %v2691_v2 = vrot.slane %v2674_v61, %v5519_v43 }
 0x36f   : > { %3400 = vmatpush1.bf16.msra.mxu0 %v5066_v6  ;;  %3482 = vmatpush1.bf16.msra.mxu1 %v5069_v7 }
 0x370   : > { %3401 = vmatprep.subr.bf16.mxu0 %v5074_v10  ;;  %3483 = vmatprep.subr.bf16.mxu1 %v5077_v12 }
 0x373   : > { %3402 = vmatpush1.bf16.msra.mxu0 %v5072_v13  ;;  %3484 = vmatpush1.bf16.msra.mxu1 %v5075_v14 }
 0x374   : > { %3403 = vmatprep.subr.bf16.mxu0 %v5080_v15  ;;  %3485 = vmatprep.subr.bf16.mxu1 %v5083_v16 }
 0x377   : > { %3404 = vmatpush1.bf16.msra.mxu0 %v5078_v17  ;;  %3486 = vmatpush1.bf16.msra.mxu1 %v5081_v18 }
 0x378   : > { %3405 = vmatprep.subr.bf16.mxu0 %v5086_v5  ;;  %3487 = vmatprep.subr.bf16.mxu1 %v5089_v20 }
 0x37b   : > { %3406 = vmatpush1.bf16.msra.mxu0 %v5084_v21  ;;  %3488 = vmatpush1.bf16.msra.mxu1 %v5087_v22 }
 0x37c   : > { %3407 = vmatprep.subr.bf16.mxu0 %v5092_v24  ;;  %3489 = vmatprep.subr.bf16.mxu1 %v5095_v25  ;;  %v4345_v25 = vld [vmem:[%s5591_s10] ss:$0 sm:$0xff] }
 0x37f   : > { %3408 = vmatpush1.bf16.msra.mxu0 %v5090_v26  ;;  %3490 = vmatpush1.bf16.msra.mxu1 %v5093_v27 }
 0x380   : > { %4380 = vmatprep.subr.bf16.mxu0 %v5096_v62  ;;  %4402 = vmatprep.subr.bf16.mxu1 %v5097_v30 }
 0x382   : > { %3410 = vmatmul.mubr.bf16.vlgmr.msra.gmra.mrb[8].mxu0 %v2544_v34  ;;  %3492 = vmatmul.mubr.bf16.vlgmr.msra.gmra.mrb[8].mxu1 %v2544_v34 }
 0x383   : > { %4381 = vmatpush3.bf16.msra.mxu0 %v5098_v31  ;;  %4403 = vmatpush3.bf16.msra.mxu1 %v5099_v32 }
 0x384   : > { %4382 = vmatprep.subr.bf16.mxu0 %v5100_v3  ;;  %4404 = vmatprep.subr.bf16.mxu1 %v5101_v35 }
 0x387   : > { %4383 = vmatpush3.bf16.msra.mxu0 %v5102_v36  ;;  %4405 = vmatpush3.bf16.msra.mxu1 %v5103_v37 }
 0x388   : > { %4384 = vmatprep.subr.bf16.mxu0 %v5104_v38  ;;  %4406 = vmatprep.subr.bf16.mxu1 %v5105_v39 }
 0x38b   : > { %4385 = vmatpush3.bf16.msra.mxu0 %v5106_v40  ;;  %4407 = vmatpush3.bf16.msra.mxu1 %v5107_v41 }
 0x38c   : > { %4386 = vmatprep.subr.bf16.mxu0 %v5108_v42  ;;  %4408 = vmatprep.subr.bf16.mxu1 %v5109_v44 }
 0x38f   : > { %4387 = vmatpush3.bf16.msra.mxu0 %v5110_v45  ;;  %4409 = vmatpush3.bf16.msra.mxu1 %v5111_v46 }
 0x390   : > { %4388 = vmatprep.subr.bf16.mxu0 %v5112_v47  ;;  %4410 = vmatprep.subr.bf16.mxu1 %v5113_v48 }
 0x393   : > { %4389 = vmatpush3.bf16.msra.mxu0 %v5114_v49  ;;  %4411 = vmatpush3.bf16.msra.mxu1 %v5115_v50 }
 0x394   : > { %4390 = vmatprep.subr.bf16.mxu0 %v5116_v51  ;;  %4412 = vmatprep.subr.bf16.mxu1 %v5117_v52 }
 0x397   : > { %4391 = vmatpush3.bf16.msra.mxu0 %v5118_v53  ;;  %4413 = vmatpush3.bf16.msra.mxu1 %v5119_v54 }
 0x398   : > { %4392 = vmatprep.subr.bf16.mxu0 %v5120_v55  ;;  %4414 = vmatprep.subr.bf16.mxu1 %v5121_v56 }
 0x39b   : > { %4393 = vmatpush3.bf16.msra.mxu0 %v5122_v28  ;;  %4415 = vmatpush3.bf16.msra.mxu1 %v5123_v57 }
 0x39c   : > { %4394 = vmatprep.subr.bf16.mxu0 %v5124_v58  ;;  %4416 = vmatprep.subr.bf16.mxu1 %v5125_v59 }
 0x39f   : > { %4395 = vmatpush3.bf16.msra.mxu0 %v5126_v60  ;;  %4417 = vmatpush3.bf16.msra.mxu1 %v5127_v33 }
 0x455   : > { %v3411_v4 = vpop.f32.mrb[8].mxu0  ;;  %v3493_v6 = vpop.f32.mrb[8].mxu1 }
 0x456   : > { %v4432_v7 = vadd.f32 %v3411_v4, %v2679_v63  ;;  %v4434_v10 = vadd.f32 %v3493_v6, %v2687_v0  ;;  %v3413_v12 = vpop.f32.mrb[9].mxu0  ;;  %v3495_v13 = vpop.f32.mrb[9].mxu1 }
 0x457   : > { %v4433_v14 = vadd.f32 %v3413_v12, %v2683_v1  ;;  %v4435_v15 = vadd.f32 %v3495_v13, %v2691_v2  ;;  %v3415_v16 = vpop.f32.mrb[10].mxu0  ;;  %v3497_v17 = vpop.f32.mrb[10].mxu1 }
 0x458   : > { %v3500_v18 = vmax.f32 %v4432_v7, 0.0  ;;  %v3502_v19 = vmax.f32 %v4434_v10, 0.0  ;;  %v3416_v5 = vpop.f32.mrb[11].mxu0  ;;  %v3498_v9 = vpop.f32.mrb[11].mxu1 }
 0x459   : > { %v3501_v20 = vmax.f32 %v4433_v14, 0.0  ;;  %v3503_v8 = vmax.f32 %v4435_v15, 0.0 }
 0x45a   : > { %v3504_v22 = vpack.c.bf16 %v3500_v18, %v3500_v18  ;;  %v3506_v43 = vpack.c.bf16 %v3502_v19, %v3502_v19 }
 0x45b   : > { %v3505_v21 = vpack.c.bf16 %v3501_v20, %v3501_v20  ;;  %v3507_v11 = vpack.c.bf16 %v3503_v8, %v3503_v8 }
 0x45d   : > { %3803 = vmatprep.mubr.bf16.mxu0 %v3505_v21  ;;  %3843 = vmatprep.mubr.bf16.mxu1 %v3507_v11 }
 0x45e   : > { %3804 = vmatmul.mubr.bf16.vlgmr.msra.gmra.mrb[12].mxu0 %v3504_v22  ;;  %3844 = vmatmul.mubr.bf16.vlgmr.msra.gmra.mrb[12].mxu1 %v3506_v43 }
 0x531   : > { %v4396_v23 = vpop.f32.mrb[12].mxu0  ;;  %v4418_v24 = vpop.f32.mrb[12].mxu1 }
 0x532   : > { %v4397_v26 = vpop.f32.mrb[13].mxu0  ;;  %v4419_v27 = vpop.f32.mrb[13].mxu1 }
 0x533   : > { %v4398_v29 = vadd.f32 %v4397_v26, %v4396_v23  ;;  %v4420_v62 = vadd.f32 %v4419_v27, %v4418_v24  ;;  %v4399_v30 = vpop.f32.mrb[14].mxu0  ;;  %v4421_v31 = vpop.f32.mrb[14].mxu1 }
 0x534   : > { %v4400_v32 = vpop.f32.mrb[15].mxu0  ;;  %v4422_v34 = vpop.f32.mrb[15].mxu1 }
 0x535   : > { %v3806_v3 = vadd.f32 %v4398_v29, %v4345_v25 }
 0x537   : > { %v3846_v35 = vadd.f32 %v4420_v62, %v3806_v3 }
 0x539   : > { %3851 = vst [vmem:[%s440_s15] sm:$0xff] %v3846_v35 }
 0x53a PF: > { %s5607_s21 = sld [smem:[#allocation12_spill]] }
 0x540   : > { %s24_s17 = sadd.s32 1, %s5607_s21  }
 0x541   : > { %p21_p6 = scmp.ge.s32.totalorder %s24_s17, 4  }
 0x543   :  { %23 = sbr.rel (!%p21_p6) target bundleno = 3 (0x3), region = 111 }
 0x54a   :  { %3871 = vsyncpa [#allocation3], 1 }
 0x54b   :  { %3873 = vsyncpa [#allocation3 + $0x1], 1 }
 0x54c   :  { %3874 = vsyncpa [#allocation5], 1 }
 0x54d   :  { %3875 = vsyncpa [#allocation8], 1 }

</bundles_post_ra>
